<compile_context>
chip_gen: v5e
topology: v5e:2x2
jax: 0.10.0
libtpu: 0.0.40
codegen_flags: <defaults>
</compile_context>

<pallas_src>
import jax
import jax.numpy as jnp
from jax.experimental import pallas as pl
from jax.experimental.pallas import tpu as pltpu

IN_DIM = 28 * 28          # 784
CHECK_HID = 100
THEN_HID = 300

SUBLANE = 8
CHECK_PAD = 128           # 100 -> 128 (lane-dense hidden)
THEN_PAD = 384            # 300 -> 384
FUSED_HID = CHECK_PAD + THEN_PAD   # 512 (fused first-layer width)


def _round_up(n, m):
    return ((n + m - 1) // m) * m


def modeld_kernel(x_ref,
                  w13_ref, b13_ref,   # fused first layers: (784, 512) bf16 / (1, 512) f32
                  w2d_ref, b2d_ref,   # folded 2-logit head: (1, 128) f32 / (1, 1) f32
                  w4_ref, b4_ref,     # then-branch layer 2: (384, 784) bf16 / (1, 784) f32
                  out_ref):
    x_bf = x_ref[...]                                    # (TB, 784) bf16 (cast in wrapper)

    # ---- fused first Linear of check + then branches (same LHS -> one MXU pass) ----
    h = jnp.dot(x_bf, w13_ref[...], preferred_element_type=jnp.float32) + b13_ref[...]
    h = jnp.maximum(h, 0.0)                              # both branches apply ReLU here
    h1 = h[:, :CHECK_PAD]                                # (TB, 128); 128-lane slice is free
    t1 = h[:, CHECK_PAD:]                                # (TB, 384)

    # ---- check head: softmax over 2 logits == sigmoid of the logit difference ----
    d = jnp.sum(h1 * w2d_ref[...], axis=-1, keepdims=True) + b2d_ref[...]   # (TB, 1)
    p = pl.reciprocal(1.0 + jnp.exp(-d), approx=True)    # then-branch weight (EUP)

    # ---- then branch second Linear ----
    then_val = jnp.dot(t1.astype(jnp.bfloat16), w4_ref[...],
                       preferred_element_type=jnp.float32) + b4_ref[...]    # (TB, 784)

    # ---- if branch: frozen eye/zeros Linear(784,784) == identity ----
    if_val = x_bf.astype(jnp.float32)

    # ---- soft conditional select: w0*if + w1*then == if + p*(then - if) ----
    out_ref[...] = if_val + p * (then_val - if_val)


def modeld_forward(x_nchw, params):
    B = x_nchw.shape[0]
    # Flatten + bf16 cast in the wrapper (halves streamed input bytes); NO
    # feature padding: (tb, 784) blocks are legal since 784 == full array dim.
    x = x_nchw.reshape(B, IN_DIM).astype(jnp.bfloat16)

    # Batch tiling: aim for >=4 grid steps when B is large (keeps both v7x TCs
    # busy), cap at 1024 rows so double-buffered in/out tiles + f32 temporaries
    # stay ~25 MB (fits v7x's 64 MiB physical VMEM).  Small B -> one full-batch
    # tile with no batch padding.
    tb = min(1024, _round_up(-(-B // 4), SUBLANE))
    if tb >= B:
        tb, b_pad = B, B                       # block dim == array dim -> legal
    else:
        b_pad = _round_up(B, tb)
    if b_pad != B:
        x = jnp.pad(x, ((0, b_pad - B), (0, 0)))
    grid = (b_pad // tb,)

    x_spec = pl.BlockSpec((tb, IN_DIM), lambda i: (i, 0))
    out_spec = pl.BlockSpec((tb, IN_DIM), lambda i: (i, 0))
    # Constant index maps -> weights stay VMEM-resident across batch tiles.
    weight_specs = [pl.BlockSpec(p.shape, lambda i: (0, 0)) for p in params]

    weight_bytes = sum(int(p.size) * p.dtype.itemsize for p in params)
    cost = pl.CostEstimate(
        flops=2 * b_pad * (IN_DIM * FUSED_HID + THEN_PAD * IN_DIM),
        transcendentals=b_pad,
        bytes_accessed=b_pad * IN_DIM * (2 + 4) + weight_bytes,   # bf16 in, f32 out
    )

    out = pl.pallas_call(
        modeld_kernel,
        out_shape=jax.ShapeDtypeStruct((b_pad, IN_DIM), jnp.float32),
        grid=grid,
        in_specs=[x_spec] + weight_specs,
        out_specs=out_spec,
        compiler_params=pltpu.CompilerParams(
            dimension_semantics=("parallel",),       # megacore sharding on v7x
            vmem_limit_bytes=48 * 1024 * 1024,       # > v5e's 16 MiB scoped default
        ),
        cost_estimate=cost,
    )(x, *params)

    return out[:B].reshape(B, 1, 28, 28)


def init_raw_params(key):
    """Deterministic synthetic parameters in PyTorch layout: weight (out, in), bias (out,)."""
    ks = jax.random.split(key, 8)
    s = 0.02
    w1 = s * jax.random.normal(ks[0], (CHECK_HID, IN_DIM), jnp.float32)
    b1 = s * jax.random.normal(ks[1], (CHECK_HID,), jnp.float32)
    w2 = s * jax.random.normal(ks[2], (2, CHECK_HID), jnp.float32)
    b2 = s * jax.random.normal(ks[3], (2,), jnp.float32)
    w3 = s * jax.random.normal(ks[4], (THEN_HID, IN_DIM), jnp.float32)
    b3 = s * jax.random.normal(ks[5], (THEN_HID,), jnp.float32)
    w4 = s * jax.random.normal(ks[6], (IN_DIM, THEN_HID), jnp.float32)
    b4 = s * jax.random.normal(ks[7], (IN_DIM,), jnp.float32)
    return dict(w1=w1, b1=b1, w2=w2, b2=b2, w3=w3, b3=b3, w4=w4, b4=b4)


def prepare_params(raw):
    """Transpose to (in, out), zero-pad only the N (output) dims to lane-dense
    widths, fuse w1/w3 (and b1/b3) into one first-layer weight, bf16 MXU
    weights, and fold the 2-logit head into a logit-difference vector."""
    def pad_n(w, n_pad):                      # torch (out, in) -> (in, n_pad)
        wt = w.T
        return jnp.pad(wt, ((0, 0), (0, n_pad - wt.shape[1])))

    w1 = pad_n(raw["w1"], CHECK_PAD)                                   # (784, 128)
    w3 = pad_n(raw["w3"], THEN_PAD)                                    # (784, 384)
    w13 = jnp.concatenate([w1, w3], axis=1).astype(jnp.bfloat16)       # (784, 512)
    b13 = jnp.concatenate([
        jnp.pad(raw["b1"], (0, CHECK_PAD - CHECK_HID)),
        jnp.pad(raw["b3"], (0, THEN_PAD - THEN_HID)),
    ]).reshape(1, FUSED_HID)                                           # (1, 512) f32

    w2d = jnp.pad(raw["w2"][1] - raw["w2"][0],
                  (0, CHECK_PAD - CHECK_HID)).reshape(1, CHECK_PAD)    # (1, 128) f32 (VPU)
    b2d = (raw["b2"][1] - raw["b2"][0]).reshape(1, 1)

    w4 = jnp.pad(raw["w4"].T, ((0, THEN_PAD - THEN_HID), (0, 0))
                 ).astype(jnp.bfloat16)                                # (384, 784)
    b4 = raw["b4"].reshape(1, IN_DIM)                                  # (1, 784) f32
    return (w13, b13, w2d, b2d, w4, b4)


def modeld_reference(x_nchw, raw):
    """Pure-JAX f32 reference of the forward pass (softmax-weighted soft select)."""
    B = x_nchw.shape[0]
    x = x_nchw.reshape(B, IN_DIM).astype(jnp.float32)
    h1 = jnp.maximum(x @ raw["w1"].T + raw["b1"], 0.0)
    logits = h1 @ raw["w2"].T + raw["b2"]
    w = jax.nn.softmax(logits, axis=-1)
    if_val = x
    t1 = jnp.maximum(x @ raw["w3"].T + raw["b3"], 0.0)
    then_val = t1 @ raw["w4"].T + raw["b4"]
    out = w[:, 0:1] * if_val + w[:, 1:2] * then_val
    return out.reshape(B, 1, 28, 28)


if __name__ == "__main__":
    key = jax.random.PRNGKey(0)
    k_x, k_p = jax.random.split(key)

    B = 2
    x = jax.random.normal(k_x, (B, 1, 28, 28), jnp.float32)    # NCHW, MNIST-sized
    raw = init_raw_params(k_p)
    params = prepare_params(raw)

    out = jax.block_until_ready(modeld_forward(x, params))
    ref = jax.block_until_ready(modeld_reference(x, raw))

    assert out.shape == (B, 1, 28, 28), out.shape
    assert bool(jnp.all(jnp.isfinite(out)))
    assert bool(jnp.allclose(out, ref, atol=5e-2, rtol=5e-2)), \
        float(jnp.max(jnp.abs(out - ref)))
    print("KERNEL_OK")
</pallas_src>

<mosaic_0001>
module attributes {stable_mosaic.version = 11 : i64} {
  func.func @modeld_kernel(%arg0: i32, %arg1: memref<2x784xbf16, #tpu.memory_space<vmem>>, %arg2: memref<784x512xbf16, #tpu.memory_space<vmem>>, %arg3: memref<1x512xf32, #tpu.memory_space<vmem>>, %arg4: memref<1x128xf32, #tpu.memory_space<vmem>>, %arg5: memref<1x1xf32, #tpu.memory_space<vmem>>, %arg6: memref<384x784xbf16, #tpu.memory_space<vmem>>, %arg7: memref<1x784xf32, #tpu.memory_space<vmem>>, %arg8: memref<2x784xf32, #tpu.memory_space<vmem>>) attributes {dimension_semantics = [#tpu.dimension_semantics<parallel>], iteration_bounds = array<i64: 1>, scalar_prefetch = 0 : i64, scratch_operands = 0 : i64, tpu.core_type = #tpu.core_type<tc>, window_params = [{transform_indices = @transform_0, window_bounds = array<i64: 2, 784>}, {pipeline_mode = #tpu.pipeline_mode<synchronous>, transform_indices = @transform_1, window_bounds = array<i64: 784, 512>}, {pipeline_mode = #tpu.pipeline_mode<synchronous>, transform_indices = @transform_2, window_bounds = array<i64: 1, 512>}, {pipeline_mode = #tpu.pipeline_mode<synchronous>, transform_indices = @transform_3, window_bounds = array<i64: 1, 128>}, {pipeline_mode = #tpu.pipeline_mode<synchronous>, transform_indices = @transform_4, window_bounds = array<i64: 1, 1>}, {pipeline_mode = #tpu.pipeline_mode<synchronous>, transform_indices = @transform_5, window_bounds = array<i64: 384, 784>}, {pipeline_mode = #tpu.pipeline_mode<synchronous>, transform_indices = @transform_6, window_bounds = array<i64: 1, 784>}, {transform_indices = @transform_7, window_bounds = array<i64: 2, 784>}]} {
    %c0 = arith.constant 0 : index
    %c0_0 = arith.constant 0 : index
    %0 = vector.load %arg1[%c0, %c0_0] : memref<2x784xbf16, #tpu.memory_space<vmem>>, vector<2x784xbf16>
    %c0_1 = arith.constant 0 : index
    %c0_2 = arith.constant 0 : index
    %1 = vector.load %arg2[%c0_1, %c0_2] : memref<784x512xbf16, #tpu.memory_space<vmem>>, vector<784x512xbf16>
    %cst = arith.constant dense<0.000000e+00> : vector<2x512xf32>
    %2 = tpu.matmul %0, %1, %cst {dimension_numbers = #tpu.dot_dimension_numbers<[1], [0], [0], [1], [0, 0, 1, 1], [], []>} : vector<2x784xbf16>, vector<784x512xbf16>, vector<2x512xf32> -> vector<2x512xf32>
    %c0_3 = arith.constant 0 : index
    %c0_4 = arith.constant 0 : index
    %3 = vector.load %arg3[%c0_3, %c0_4] : memref<1x512xf32, #tpu.memory_space<vmem>>, vector<1x512xf32>
    %4 = vector.broadcast %3 : vector<1x512xf32> to vector<2x512xf32>
    %5 = arith.addf %2, %4 : vector<2x512xf32>
    %cst_5 = arith.constant 0.000000e+00 : f32
    %6 = vector.broadcast %cst_5 : f32 to vector<2x512xf32>
    %7 = arith.maximumf %5, %6 : vector<2x512xf32>
    %8 = vector.extract_strided_slice %7 {offsets = [0, 0], sizes = [2, 128], strides = [1, 1]} : vector<2x512xf32> to vector<2x128xf32>
    %9 = vector.extract_strided_slice %7 {offsets = [0, 128], sizes = [2, 384], strides = [1, 1]} : vector<2x512xf32> to vector<2x384xf32>
    %c0_6 = arith.constant 0 : index
    %c0_7 = arith.constant 0 : index
    %10 = vector.load %arg4[%c0_6, %c0_7] : memref<1x128xf32, #tpu.memory_space<vmem>>, vector<1x128xf32>
    %11 = vector.broadcast %10 : vector<1x128xf32> to vector<2x128xf32>
    %12 = arith.mulf %8, %11 : vector<2x128xf32>
    %cst_8 = arith.constant dense<0.000000e+00> : vector<2xf32>
    %13 = vector.multi_reduction <add>, %12, %cst_8 [1] : vector<2x128xf32> to vector<2xf32>
    %14 = vector.shape_cast %13 : vector<2xf32> to vector<2x1xf32>
    %c0_9 = arith.constant 0 : index
    %c0_10 = arith.constant 0 : index
    %15 = vector.load %arg5[%c0_9, %c0_10] : memref<1x1xf32, #tpu.memory_space<vmem>>, vector<1x1xf32>
    %16 = vector.broadcast %15 : vector<1x1xf32> to vector<2x1xf32>
    %17 = arith.addf %14, %16 : vector<2x1xf32>
    %cst_11 = arith.constant 0.000000e+00 : f32
    %18 = vector.broadcast %cst_11 : f32 to vector<2x1xf32>
    %19 = arith.subf %18, %17 : vector<2x1xf32>
    %20 = math.exp %19 : vector<2x1xf32>
    %cst_12 = arith.constant 1.000000e+00 : f32
    %21 = vector.broadcast %cst_12 : f32 to vector<2x1xf32>
    %22 = arith.addf %21, %20 : vector<2x1xf32>
    %23 = tpu.reciprocal %22 {approx = true} : vector<2x1xf32> -> vector<2x1xf32>
    %24 = arith.truncf %9 : vector<2x384xf32> to vector<2x384xbf16>
    %c0_13 = arith.constant 0 : index
    %c0_14 = arith.constant 0 : index
    %25 = vector.load %arg6[%c0_13, %c0_14] : memref<384x784xbf16, #tpu.memory_space<vmem>>, vector<384x784xbf16>
    %cst_15 = arith.constant dense<0.000000e+00> : vector<2x784xf32>
    %26 = tpu.matmul %24, %25, %cst_15 {dimension_numbers = #tpu.dot_dimension_numbers<[1], [0], [0], [1], [0, 0, 1, 1], [], []>} : vector<2x384xbf16>, vector<384x784xbf16>, vector<2x784xf32> -> vector<2x784xf32>
    %c0_16 = arith.constant 0 : index
    %c0_17 = arith.constant 0 : index
    %27 = vector.load %arg7[%c0_16, %c0_17] : memref<1x784xf32, #tpu.memory_space<vmem>>, vector<1x784xf32>
    %28 = vector.broadcast %27 : vector<1x784xf32> to vector<2x784xf32>
    %29 = arith.addf %26, %28 : vector<2x784xf32>
    %30 = arith.extf %0 : vector<2x784xbf16> to vector<2x784xf32>
    %31 = arith.subf %29, %30 : vector<2x784xf32>
    %32 = vector.broadcast %23 : vector<2x1xf32> to vector<2x784xf32>
    %33 = arith.mulf %32, %31 : vector<2x784xf32>
    %34 = arith.addf %30, %33 : vector<2x784xf32>
    %c0_18 = arith.constant 0 : index
    %c0_19 = arith.constant 0 : index
    %35 = vector.load %arg8[%c0_18, %c0_19] : memref<2x784xf32, #tpu.memory_space<vmem>>, vector<2x784xf32>
    tpu.vector_store %arg8[%c0_18, %c0_19], %34 {strides = array<i32>} : memref<2x784xf32, #tpu.memory_space<vmem>>, vector<2x784xf32>,
    return
  }
  func.func @transform_0(%arg0: i32) -> (i32, i32) {
    %c0_i32 = arith.constant 0 : i32
    %c0_i32_0 = arith.constant 0 : i32
    return %arg0, %c0_i32 : i32, i32
  }
  func.func @transform_1(%arg0: i32) -> (i32, i32) {
    %c0_i32 = arith.constant 0 : i32
    %c0_i32_0 = arith.constant 0 : i32
    %c0_i32_1 = arith.constant 0 : i32
    return %c0_i32, %c0_i32_0 : i32, i32
  }
  func.func @transform_2(%arg0: i32) -> (i32, i32) {
    %c0_i32 = arith.constant 0 : i32
    %c0_i32_0 = arith.constant 0 : i32
    %c0_i32_1 = arith.constant 0 : i32
    return %c0_i32, %c0_i32_0 : i32, i32
  }
  func.func @transform_3(%arg0: i32) -> (i32, i32) {
    %c0_i32 = arith.constant 0 : i32
    %c0_i32_0 = arith.constant 0 : i32
    %c0_i32_1 = arith.constant 0 : i32
    return %c0_i32, %c0_i32_0 : i32, i32
  }
  func.func @transform_4(%arg0: i32) -> (i32, i32) {
    %c0_i32 = arith.constant 0 : i32
    %c0_i32_0 = arith.constant 0 : i32
    %c0_i32_1 = arith.constant 0 : i32
    return %c0_i32, %c0_i32_0 : i32, i32
  }
  func.func @transform_5(%arg0: i32) -> (i32, i32) {
    %c0_i32 = arith.constant 0 : i32
    %c0_i32_0 = arith.constant 0 : i32
    %c0_i32_1 = arith.constant 0 : i32
    return %c0_i32, %c0_i32_0 : i32, i32
  }
  func.func @transform_6(%arg0: i32) -> (i32, i32) {
    %c0_i32 = arith.constant 0 : i32
    %c0_i32_0 = arith.constant 0 : i32
    %c0_i32_1 = arith.constant 0 : i32
    return %c0_i32, %c0_i32_0 : i32, i32
  }
  func.func @transform_7(%arg0: i32) -> (i32, i32) {
    %c0_i32 = arith.constant 0 : i32
    %c0_i32_0 = arith.constant 0 : i32
    return %arg0, %c0_i32 : i32, i32
  }
}

</mosaic_0001>

<bundles_post_ra>
// kernel: tpu_custom_call.1
= control target key start
LH: loop header
LB: loop body
LE: loop exit
PB: predicated region body
PF: predicated region fallthrough
CT: control target
= control target key end

     0   :  { %s7310_s0 = inlined_call_operand.vmem [shape: bf16[2,784], index: 0, kind: input, shape index: {}]   ;;  %s7311_s1 = inlined_call_operand.vmem [shape: bf16[784,512], index: 1, kind: input, shape index: {}]   ;;  %s7312_s2 = inlined_call_operand.vmem [shape: f32[1,512], index: 2, kind: input, shape index: {}]   ;;  %s7313_s3 = inlined_call_operand.vmem [shape: f32[1,128], index: 3, kind: input, shape index: {}]   ;;  %s7314_s4 = inlined_call_operand.<no memory space> [shape: f32[1,1], index: 4, kind: input, shape index: {}]   ;;  %s7315_s5 = inlined_call_operand.vmem [shape: bf16[384,784], index: 5, kind: input, shape index: {}]   ;;  %s7316_s6 = inlined_call_operand.vmem [shape: f32[1,784], index: 6, kind: input, shape index: {}]   ;;  %s7317_s7 = inlined_call_operand.hbm [shape: f32[2,784], index: 7, kind: output, shape index: {}]  }
   0x1   :  { %v12_v0 = vstv %s7314_s4 }
   0x2   :  { %13 = vst [vmem:[#allocation2] sm:$0x1] %v12_v0 }
   0x3   :  { %v3169_v1 = vld [vmem:[%s7311_s1 + $0xe0] sm:$0xf]  ;;  %v4545_v2 = vld [vmem:[%s7311_s1 + $0xec] sm:$0xf0]  ;;  %vm1232_vm0 = vcmask 130048  }
   0x4   :  { %v3297_v3 = vld [vmem:[%s7311_s1 + $0x1e0] sm:$0xf]  ;;  %v3170_v4 = vor.u32 %v4545_v2, %v3169_v1  ;;  %v4577_v5 = vld [vmem:[%s7311_s1 + $0x1ec] sm:$0xf0] }
   0x5   :  { %v3425_v6 = vld [vmem:[%s7311_s1 + $0x2e0] sm:$0xf]  ;;  %v4609_v7 = vld [vmem:[%s7311_s1 + $0x2ec] sm:$0xf0]  ;;  %v3298_v8 = vor.u32 %v4577_v5, %v3297_v3 }
   0x6   :  { %v3426_v9 = vor.u32 %v4609_v7, %v3425_v6  ;;  %v3553_v10 = vld [vmem:[%s7311_s1 + $0x3e0] sm:$0xf]  ;;  %v4641_v11 = vld [vmem:[%s7311_s1 + $0x3ec] sm:$0xf0]  ;;  %1235 = vmatpush.bf16.msra.mxu0 %v3170_v4 }
   0x7   :  { %v3153_v12 = vld [vmem:[%s7311_s1 + $0xc0] sm:$0xf]  ;;  %v3554_v13 = vor.u32 %v4641_v11, %v3553_v10  ;;  %v4541_v14 = vld [vmem:[%s7311_s1 + $0xcc] sm:$0xf0]  ;;  %1248 = vmatpush.bf16.msra.mxu1 %v3298_v8 }
   0x8   :  { %v3281_v15 = vld [vmem:[%s7311_s1 + $0x1c0] sm:$0xf]  ;;  %v4573_v16 = vld [vmem:[%s7311_s1 + $0x1cc] sm:$0xf0]  ;;  %1261 = vmatpush.bf16.msra.mxu2 %v3426_v9  ;;  %v3154_v17 = vor.u32 %v4541_v14, %v3153_v12 }
   0x9   :  { %v3282_v18 = vor.u32 %v4573_v16, %v3281_v15  ;;  %v3409_v19 = vld [vmem:[%s7311_s1 + $0x2c0] sm:$0xf]  ;;  %v4605_v20 = vld [vmem:[%s7311_s1 + $0x2cc] sm:$0xf0]  ;;  %1274 = vmatpush.bf16.msra.mxu3 %v3554_v13 }
   0xa   :  { %v3537_v21 = vld [vmem:[%s7311_s1 + $0x3c0] sm:$0xf]  ;;  %v3410_v22 = vor.u32 %v4605_v20, %v3409_v19  ;;  %v4637_v23 = vld [vmem:[%s7311_s1 + $0x3cc] sm:$0xf0]  ;;  %1236 = vmatpush.bf16.msra.mxu0 %v3154_v17 }
   0xb   :  { %v3137_v24 = vld [vmem:[%s7311_s1 + $0xa0] sm:$0xf]  ;;  %v4537_v25 = vld [vmem:[%s7311_s1 + $0xac] sm:$0xf0]  ;;  %v3538_v26 = vor.u32 %v4637_v23, %v3537_v21  ;;  %1249 = vmatpush.bf16.msra.mxu1 %v3282_v18 }
   0xc   :  { %v3265_v27 = vld [vmem:[%s7311_s1 + $0x1a0] sm:$0xf]  ;;  %v4569_v28 = vld [vmem:[%s7311_s1 + $0x1ac] sm:$0xf0]  ;;  %v3138_v30 = vor.u32 %v4537_v25, %v3137_v24  ;;  %1262 = vmatpush.bf16.msra.mxu2 %v3410_v22 }
   0xd   :  { %v3393_v29 = vld [vmem:[%s7311_s1 + $0x2a0] sm:$0xf]  ;;  %v4601_v31 = vld [vmem:[%s7311_s1 + $0x2ac] sm:$0xf0]  ;;  %v3266_v34 = vor.u32 %v4569_v28, %v3265_v27  ;;  %1275 = vmatpush.bf16.msra.mxu3 %v3538_v26 }
   0xe   :  { %v3521_v32 = vld [vmem:[%s7311_s1 + $0x3a0] sm:$0xf]  ;;  %v4633_v33 = vld [vmem:[%s7311_s1 + $0x3ac] sm:$0xf0]  ;;  %v3394_v35 = vor.u32 %v4601_v31, %v3393_v29  ;;  %1237 = vmatpush.bf16.msra.mxu0 %v3138_v30 }
   0xf   :  { %v3121_v36 = vld [vmem:[%s7311_s1 + $0x80] sm:$0xf]  ;;  %v4533_v37 = vld [vmem:[%s7311_s1 + $0x8c] sm:$0xf0]  ;;  %v3522_v39 = vor.u32 %v4633_v33, %v3521_v32  ;;  %1250 = vmatpush.bf16.msra.mxu1 %v3266_v34 }
  0x10   :  { %v3249_v38 = vld [vmem:[%s7311_s1 + $0x180] sm:$0xf]  ;;  %v4565_v40 = vld [vmem:[%s7311_s1 + $0x18c] sm:$0xf0]  ;;  %v3122_v45 = vor.u32 %v4533_v37, %v3121_v36  ;;  %1263 = vmatpush.bf16.msra.mxu2 %v3394_v35  ;;  %v4543_v35 = vld [vmem:[%s7311_s1 + $0xe4] sm:$0xf] }
  0x11   :  { %v3377_v41 = vld [vmem:[%s7311_s1 + $0x280] sm:$0xf]  ;;  %v4597_v42 = vld [vmem:[%s7311_s1 + $0x28c] sm:$0xf0]  ;;  %v3250_v46 = vor.u32 %v4565_v40, %v3249_v38  ;;  %1276 = vmatpush.bf16.msra.mxu3 %v3522_v39  ;;  %v3171_v36 = vld [vmem:[%s7311_s1 + $0xf0] sm:$0xf0] }
  0x12   :  { %v3505_v43 = vld [vmem:[%s7311_s1 + $0x380] sm:$0xf]  ;;  %v4629_v44 = vld [vmem:[%s7311_s1 + $0x38c] sm:$0xf0]  ;;  %v3378_v47 = vor.u32 %v4597_v42, %v3377_v41  ;;  %1238 = vmatpush.bf16.msra.mxu0 %v3122_v45 }
  0x13   :  { %v3105_v48 = vld [vmem:[%s7311_s1 + $0x60] sm:$0xf]  ;;  %v4529_v49 = vld [vmem:[%s7311_s1 + $0x6c] sm:$0xf0]  ;;  %v3506_v51 = vor.u32 %v4629_v44, %v3505_v43  ;;  %1251 = vmatpush.bf16.msra.mxu1 %v3250_v46  ;;  %v4575_v43 = vld [vmem:[%s7311_s1 + $0x1e4] sm:$0xf]  ;;  %v3174_v46 = vor.u32 %v4543_v35, %v3171_v36 }
  0x14   :  { %v3233_v50 = vld [vmem:[%s7311_s1 + $0x160] sm:$0xf]  ;;  %v4561_v52 = vld [vmem:[%s7311_s1 + $0x16c] sm:$0xf0]  ;;  %v3106_v57 = vor.u32 %v4529_v49, %v3105_v48  ;;  %1264 = vmatpush.bf16.msra.mxu2 %v3378_v47  ;;  %v3299_v44 = vld [vmem:[%s7311_s1 + $0x1f0] sm:$0xf0] }
  0x15   :  { %v3361_v53 = vld [vmem:[%s7311_s1 + $0x260] sm:$0xf]  ;;  %v4593_v54 = vld [vmem:[%s7311_s1 + $0x26c] sm:$0xf0]  ;;  %v3234_v58 = vor.u32 %v4561_v52, %v3233_v50  ;;  %1277 = vmatpush.bf16.msra.mxu3 %v3506_v51  ;;  %v4539_v51 = vld [vmem:[%s7311_s1 + $0xc4] sm:$0xf] }
  0x16   :  { %v3489_v55 = vld [vmem:[%s7311_s1 + $0x360] sm:$0xf]  ;;  %v4625_v56 = vld [vmem:[%s7311_s1 + $0x36c] sm:$0xf0]  ;;  %v3362_v59 = vor.u32 %v4593_v54, %v3361_v53  ;;  %1239 = vmatpush.bf16.msra.mxu0 %v3106_v57  ;;  %v3155_v52 = vld [vmem:[%s7311_s1 + $0xd0] sm:$0xf0] }
  0x17   :  { %v3089_v60 = vld [vmem:[%s7311_s1 + $0x40] sm:$0xf]  ;;  %v4525_v61 = vld [vmem:[%s7311_s1 + $0x4c] sm:$0xf0]  ;;  %v3490_v63 = vor.u32 %v4625_v56, %v3489_v55  ;;  %1252 = vmatpush.bf16.msra.mxu1 %v3234_v58  ;;  %v3302_v56 = vor.u32 %v4575_v43, %v3299_v44  ;;  %v4571_v58 = vld [vmem:[%s7311_s1 + $0x1c4] sm:$0xf] }
  0x18   :  { %v3217_v62 = vld [vmem:[%s7311_s1 + $0x140] sm:$0xf]  ;;  %v4557_v0 = vld [vmem:[%s7311_s1 + $0x14c] sm:$0xf0]  ;;  %v3090_v5 = vor.u32 %v4525_v61, %v3089_v60  ;;  %1265 = vmatpush.bf16.msra.mxu2 %v3362_v59  ;;  %v3283_v59 = vld [vmem:[%s7311_s1 + $0x1d0] sm:$0xf0] }
  0x19   :  { %v3345_v1 = vld [vmem:[%s7311_s1 + $0x240] sm:$0xf]  ;;  %v4589_v2 = vld [vmem:[%s7311_s1 + $0x24c] sm:$0xf0]  ;;  %v3218_v6 = vor.u32 %v4557_v0, %v3217_v62  ;;  %1278 = vmatpush.bf16.msra.mxu3 %v3490_v63  ;;  %v3158_v62 = vor.u32 %v4539_v51, %v3155_v52 }
  0x1a   :  { %v3473_v3 = vld [vmem:[%s7311_s1 + $0x340] sm:$0xf]  ;;  %v4621_v4 = vld [vmem:[%s7311_s1 + $0x34c] sm:$0xf0]  ;;  %v3346_v7 = vor.u32 %v4589_v2, %v3345_v1  ;;  %1240 = vmatpush.bf16.msra.mxu0 %v3090_v5 }
  0x1b   :  { %v3073_v8 = vld [vmem:[%s7311_s1 + $0x20] sm:$0xf]  ;;  %v4521_v9 = vld [vmem:[%s7311_s1 + $0x2c] sm:$0xf0]  ;;  %v3474_v11 = vor.u32 %v4621_v4, %v3473_v3  ;;  %1253 = vmatpush.bf16.msra.mxu1 %v3218_v6  ;;  %v4535_v3 = vld [vmem:[%s7311_s1 + $0xa4] sm:$0xf]  ;;  %v3286_v6 = vor.u32 %v4571_v58, %v3283_v59 }
  0x1c   :  { %v3201_v10 = vld [vmem:[%s7311_s1 + $0x120] sm:$0xf]  ;;  %v4553_v12 = vld [vmem:[%s7311_s1 + $0x12c] sm:$0xf0]  ;;  %v3074_v18 = vor.u32 %v4521_v9, %v3073_v8  ;;  %1266 = vmatpush.bf16.msra.mxu2 %v3346_v7  ;;  %v3139_v4 = vld [vmem:[%s7311_s1 + $0xb0] sm:$0xf0] }
  0x1d   :  { %v3329_v13 = vld [vmem:[%s7311_s1 + $0x220] sm:$0xf]  ;;  %v4585_v14 = vld [vmem:[%s7311_s1 + $0x22c] sm:$0xf0]  ;;  %v3202_v22 = vor.u32 %v4553_v12, %v3201_v10  ;;  %1279 = vmatpush.bf16.msra.mxu3 %v3474_v11  ;;  %v4567_v8 = vld [vmem:[%s7311_s1 + $0x1a4] sm:$0xf]  ;;  %v3142_v11 = vor.u32 %v4535_v3, %v3139_v4 }
  0x1e   :  { %v3457_v15 = vld [vmem:[%s7311_s1 + $0x320] sm:$0xf]  ;;  %v4617_v16 = vld [vmem:[%s7311_s1 + $0x32c] sm:$0xf0]  ;;  %v3330_v23 = vor.u32 %v4585_v14, %v3329_v13  ;;  %1241 = vmatpush.bf16.msra.mxu0 %v3074_v18  ;;  %v3267_v9 = vld [vmem:[%s7311_s1 + $0x1b0] sm:$0xf0] }
  0x1f   :  { %v3057_v17 = vld [vmem:[%s7311_s1] sm:$0xf]  ;;  %v4517_v19 = vld [vmem:[%s7311_s1 + $0xc] sm:$0xf0]  ;;  %v3458_v26 = vor.u32 %v4617_v16, %v3457_v15  ;;  %1254 = vmatpush.bf16.msra.mxu1 %v3202_v22  ;;  %v4531_v16 = vld [vmem:[%s7311_s1 + $0x84] sm:$0xf]  ;;  %v3270_v18 = vor.u32 %v4567_v8, %v3267_v9 }
  0x20   :  { %v3185_v20 = vld [vmem:[%s7311_s1 + $0x100] sm:$0xf]  ;;  %v4549_v24 = vld [vmem:[%s7311_s1 + $0x10c] sm:$0xf0]  ;;  %v3058_v33 = vor.u32 %v4517_v19, %v3057_v17  ;;  %1267 = vmatpush.bf16.msra.mxu2 %v3330_v23  ;;  %v3123_v17 = vld [vmem:[%s7311_s1 + $0x90] sm:$0xf0] }
  0x21   :  { %v5146_v21 = vld [vmem:[%s7310_s0] sm:$0x7f]  ;;  %v4581_v27 = vld [vmem:[%s7311_s1 + $0x20c] sm:$0xf0]  ;;  %v3186_v37 = vor.u32 %v4549_v24, %v3185_v20  ;;  %1280 = vmatpush.bf16.msra.mxu3 %v3458_v26  ;;  %v3251_v22 = vld [vmem:[%s7311_s1 + $0x190] sm:$0xf0]  ;;  %v3126_v24 = vor.u32 %v4531_v16, %v3123_v17 }
  0x22   :  { %v3313_v25 = vld [vmem:[%s7311_s1 + $0x200] sm:$0xf]  ;;  %238 = vst [vmem:[#allocation1] ss:$9 sm:$0xff] %v5146_v21  ;;  %v4613_v29 = vld [vmem:[%s7311_s1 + $0x30c] sm:$0xf0]  ;;  %1242 = vmatpush.bf16.msra.mxu0 %v3058_v33 }
  0x23   :  { %v3441_v28 = vld [vmem:[%s7311_s1 + $0x300] sm:$0xf]  ;;  %v4673_v31 = vld [vmem:[%s7311_s1 + $0x4ec] sm:$0xf0]  ;;  %v3314_v38 = vor.u32 %v4581_v27, %v3313_v25  ;;  %1255 = vmatpush.bf16.msra.mxu1 %v3186_v37  ;;  %v4563_v20 = vld [vmem:[%s7311_s1 + $0x184] sm:$0xf] }
  0x24   :  { %v3681_v30 = vld [vmem:[%s7311_s1 + $0x4e0] sm:$0xf]  ;;  %v4705_v34 = vld [vmem:[%s7311_s1 + $0x5ec] sm:$0xf0]  ;;  %v3442_v40 = vor.u32 %v4613_v29, %v3441_v28  ;;  %v4527_v29 = vld [vmem:[%s7311_s1 + $0x64] sm:$0xf] }
  0x25   :  { %v3809_v32 = vld [vmem:[%s7311_s1 + $0x5e0] sm:$0xf]  ;;  %v3682_v41 = vor.u32 %v4673_v31, %v3681_v30  ;;  %v4709_v42 = vld [vmem:[%s7311_s1 + $0x60c] sm:$0xf0]  ;;  %1268 = vmatpush.bf16.msra.mxu2 %v3314_v38  ;;  %v3107_v30 = vld [vmem:[%s7311_s1 + $0x70] sm:$0xf0]  ;;  %v3254_v31 = vor.u32 %v4563_v20, %v3251_v22 }
  0x26   :  { %v3825_v39 = vld [vmem:[%s7311_s1 + $0x600] sm:$0xf]  ;;  %v3810_v45 = vor.u32 %v4705_v34, %v3809_v32  ;;  %v4669_v48 = vld [vmem:[%s7311_s1 + $0x4cc] sm:$0xf0]  ;;  %1281 = vmatpush.bf16.msra.mxu3 %v3442_v40  ;;  %v4559_v33 = vld [vmem:[%s7311_s1 + $0x164] sm:$0xf]  ;;  %v3110_v36 = vor.u32 %v4527_v29, %v3107_v30 }
  0x27   :  { %v3665_v47 = vld [vmem:[%s7311_s1 + $0x4c0] sm:$0xf]  ;;  %v4701_v50 = vld [vmem:[%s7311_s1 + $0x5cc] sm:$0xf0]  ;;  %v3826_v54 = vor.u32 %v4709_v42, %v3825_v39  ;;  %1287 = vmatpush.bf16.msrb.mxu0 %v3682_v41  ;;  %v3235_v34 = vld [vmem:[%s7311_s1 + $0x170] sm:$0xf0] }
  0x28   :  { %v3793_v49 = vld [vmem:[%s7311_s1 + $0x5c0] sm:$0xf]  ;;  %v3666_v57 = vor.u32 %v4669_v48, %v3665_v47  ;;  %1300 = vmatpush.bf16.msrb.mxu1 %v3810_v45  ;;  %v4665_v0 = vld [vmem:[%s7311_s1 + $0x4ac] sm:$0xf0]  ;;  %v4523_v41 = vld [vmem:[%s7311_s1 + $0x44] sm:$0xf]  ;;  %v3238_v44 = vor.u32 %v4559_v33, %v3235_v34 }
  0x29   :  { %v5212_v53 = vld [vmem:[#allocation1 + $0x12] sm:$0xff]  ;;  %v5214_v55 = vld [vmem:[#allocation1] sm:$0xff]  ;;  %v3794_v61 = vor.u32 %v4701_v50, %v3793_v49  ;;  %1320 = vmatpush.bf16.msrb.mxu2 %v3826_v54  ;;  %v5245_v5 = vld [vmem:[#allocation1 + $0x9] sm:$0xff] }
  0x2a   :  { %v5222_v60 = vld [vmem:[#allocation1 + $0x1b] sm:$0xff]  ;;  %1326 = vmatpush.bf16.msrb.mxu3 %v3174_v46  ;;  %1269 = vmatmul.bf16.vlgmr.msra.gmra.mxu2 %v5212_v53  ;;  %v4697_v2 = vld [vmem:[%s7311_s1 + $0x5ac] sm:$0xf0]  ;;  %v3091_v42 = vld [vmem:[%s7311_s1 + $0x50] sm:$0xf0] }
  0x2b   :  { %v3649_v63 = vld [vmem:[%s7311_s1 + $0x4a0] sm:$0xf]  ;;  %1243 = vmatmul.bf16.vlgmr.msra.gmra.mxu0 %v5214_v55  ;;  %1282 = vmatmul.bf16.vlgmr.msra.gmra.mxu3 %v5222_v60  ;;  %v4661_v13 = vld [vmem:[%s7311_s1 + $0x48c] sm:$0xf0]  ;;  %v5320_v43 = vld [vmem:[#allocation1 + $0x36] sm:$0xff]  ;;  %v3094_v49 = vor.u32 %v4523_v41, %v3091_v42 }
  0x2c   :  { %v3777_v1 = vld [vmem:[%s7311_s1 + $0x5a0] sm:$0xf]  ;;  %1288 = vmatpush.bf16.msrb.mxu0 %v3666_v57  ;;  %v3650_v7 = vor.u32 %v4665_v0, %v3649_v63  ;;  %1301 = vmatpush.bf16.msrb.mxu1 %v3794_v61  ;;  %v4693_v15 = vld [vmem:[%s7311_s1 + $0x58c] sm:$0xf0]  ;;  %v4555_v46 = vld [vmem:[%s7311_s1 + $0x144] sm:$0xf] }
  0x2d   :  { %1339 = vmatpush.bf16.msra.mxu2 %v3302_v56  ;;  %v3778_v10 = vor.u32 %v4697_v2, %v3777_v1  ;;  %v3633_v12 = vld [vmem:[%s7311_s1 + $0x480] sm:$0xf]  ;;  %1256 = vmatmul.bf16.vlgmr.msra.gmra.mxu1 %v5245_v5  ;;  %v4657_v26 = vld [vmem:[%s7311_s1 + $0x46c] sm:$0xf0]  ;;  %v3219_v47 = vld [vmem:[%s7311_s1 + $0x150] sm:$0xf0] }
  0x2e   :  { %1327 = vmatpush.bf16.msrb.mxu3 %v3158_v62  ;;  %v3761_v14 = vld [vmem:[%s7311_s1 + $0x580] sm:$0xf]  ;;  %v3634_v19 = vor.u32 %v4661_v13, %v3633_v12  ;;  %v4689_v28 = vld [vmem:[%s7311_s1 + $0x56c] sm:$0xf0]  ;;  %v4519_v56 = vld [vmem:[%s7311_s1 + $0x24] sm:$0xf]  ;;  %v3222_v58 = vor.u32 %v4555_v46, %v3219_v47 }
  0x2f   :  { %v3762_v23 = vor.u32 %v4693_v15, %v3761_v14  ;;  %v3617_v25 = vld [vmem:[%s7311_s1 + $0x460] sm:$0xf]  ;;  %v4653_v38 = vld [vmem:[%s7311_s1 + $0x44c] sm:$0xf0]  ;;  %v3075_v57 = vld [vmem:[%s7311_s1 + $0x30] sm:$0xf0] }
  0x30   :  { %1289 = vmatpush.bf16.msrb.mxu0 %v3650_v7  ;;  %1302 = vmatpush.bf16.msrb.mxu1 %v3778_v10  ;;  %v3745_v27 = vld [vmem:[%s7311_s1 + $0x560] sm:$0xf]  ;;  %v3618_v32 = vor.u32 %v4657_v26, %v3617_v25  ;;  %v4685_v40 = vld [vmem:[%s7311_s1 + $0x54c] sm:$0xf0]  ;;  %v4551_v61 = vld [vmem:[%s7311_s1 + $0x124] sm:$0xf]  ;;  %v3078_v1 = vor.u32 %v4519_v56, %v3075_v57 }
  0x31   :  { %1340 = vmatpush.bf16.msra.mxu2 %v3286_v6  ;;  %v3746_v35 = vor.u32 %v4689_v28, %v3745_v27  ;;  %v3601_v37 = vld [vmem:[%s7311_s1 + $0x440] sm:$0xf]  ;;  %v4649_v51 = vld [vmem:[%s7311_s1 + $0x42c] sm:$0xf0]  ;;  %v3203_v62 = vld [vmem:[%s7311_s1 + $0x130] sm:$0xf0] }
  0x32   :  { %1328 = vmatpush.bf16.msrb.mxu3 %v3142_v11  ;;  %v3729_v39 = vld [vmem:[%s7311_s1 + $0x540] sm:$0xf]  ;;  %v3602_v45 = vor.u32 %v4653_v38, %v3601_v37  ;;  %v4681_v54 = vld [vmem:[%s7311_s1 + $0x52c] sm:$0xf0]  ;;  %v4515_v6 = vld [vmem:[%s7311_s1 + $0x4] sm:$0xf]  ;;  %v3206_v12 = vor.u32 %v4551_v61, %v3203_v62 }
  0x33   :  { %v3730_v48 = vor.u32 %v4685_v40, %v3729_v39  ;;  %v3585_v50 = vld [vmem:[%s7311_s1 + $0x420] sm:$0xf]  ;;  %v4645_v2 = vld [vmem:[%s7311_s1 + $0x40c] sm:$0xf0]  ;;  %v3059_v7 = vld [vmem:[%s7311_s1 + $0x10] sm:$0xf0] }
  0x34   :  { %1290 = vmatpush.bf16.msrb.mxu0 %v3634_v19  ;;  %1303 = vmatpush.bf16.msrb.mxu1 %v3762_v23  ;;  %v3713_v52 = vld [vmem:[%s7311_s1 + $0x520] sm:$0xf]  ;;  %v3586_v59 = vor.u32 %v4649_v51, %v3585_v50  ;;  %v4677_v4 = vld [vmem:[%s7311_s1 + $0x50c] sm:$0xf0]  ;;  %v4607_v8 = vld [vmem:[%s7311_s1 + $0x2e4] sm:$0xf]  ;;  %v3062_v17 = vor.u32 %v4515_v6, %v3059_v7 }
  0x35   :  { %1341 = vmatpush.bf16.msra.mxu2 %v3270_v18  ;;  %v3569_v63 = vld [vmem:[%s7311_s1 + $0x400] sm:$0xf]  ;;  %v3714_v0 = vor.u32 %v4681_v54, %v3713_v52  ;;  %v3427_v9 = vld [vmem:[%s7311_s1 + $0x2f0] sm:$0xf0]  ;;  %v4639_v10 = vld [vmem:[%s7311_s1 + $0x3e4] sm:$0xf] }
  0x36   :  { %1329 = vmatpush.bf16.msrb.mxu3 %v3126_v24  ;;  %v3697_v3 = vld [vmem:[%s7311_s1 + $0x500] sm:$0xf]  ;;  %v3555_v11 = vld [vmem:[%s7311_s1 + $0x3f0] sm:$0xf0]  ;;  %v3570_v13 = vor.u32 %v4645_v2, %v3569_v63  ;;  %v4671_v14 = vld [vmem:[%s7311_s1 + $0x4e4] sm:$0xf]  ;;  %v3430_v20 = vor.u32 %v4607_v8, %v3427_v9 }
  0x37   :  { %v3683_v15 = vld [vmem:[%s7311_s1 + $0x4f0] sm:$0xf0]  ;;  %v3698_v16 = vor.u32 %v4677_v4, %v3697_v3  ;;  %v4547_v18 = vld [vmem:[%s7311_s1 + $0x104] sm:$0xf]  ;;  %v3558_v22 = vor.u32 %v4639_v10, %v3555_v11 }
  0x38   :  { %1291 = vmatpush.bf16.msrb.mxu0 %v3618_v32  ;;  %1304 = vmatpush.bf16.msrb.mxu1 %v3746_v35  ;;  %v3187_v19 = vld [vmem:[%s7311_s1 + $0x110] sm:$0xf0]  ;;  %v4703_v23 = vld [vmem:[%s7311_s1 + $0x5e4] sm:$0xf]  ;;  %v3686_v26 = vor.u32 %v4671_v14, %v3683_v15 }
  0x39   :  { %1342 = vmatpush.bf16.msra.mxu2 %v3254_v31  ;;  %v3811_v24 = vld [vmem:[%s7311_s1 + $0x5f0] sm:$0xf0]  ;;  %v4603_v25 = vld [vmem:[%s7311_s1 + $0x2c4] sm:$0xf]  ;;  %v3190_v31 = vor.u32 %v4547_v18, %v3187_v19 }
  0x3a   :  { %1330 = vmatpush.bf16.msrb.mxu3 %v3110_v36  ;;  %3839 = vmatmul.msk.bf16.vlgmr.msrb.gmra.mxu2 %vm1232_vm0, %v5320_v43  ;;  %v3411_v27 = vld [vmem:[%s7311_s1 + $0x2d0] sm:$0xf0]  ;;  %v4635_v28 = vld [vmem:[%s7311_s1 + $0x3c4] sm:$0xf]  ;;  %v3814_v34 = vor.u32 %v4703_v23, %v3811_v24 }
  0x3b   :  { %v3539_v29 = vld [vmem:[%s7311_s1 + $0x3d0] sm:$0xf0]  ;;  %v5414_v30 = vld [vmem:[#allocation1 + $0x24] sm:$0xff]  ;;  %v3414_v36 = vor.u32 %v4603_v25, %v3411_v27 }
  0x3c   :  { %1292 = vmatpush.bf16.msrb.mxu0 %v3602_v45  ;;  %1305 = vmatpush.bf16.msrb.mxu1 %v3730_v48  ;;  %v4667_v32 = vld [vmem:[%s7311_s1 + $0x4c4] sm:$0xf]  ;;  %v3667_v33 = vld [vmem:[%s7311_s1 + $0x4d0] sm:$0xf0]  ;;  %v3542_v37 = vor.u32 %v4635_v28, %v3539_v29 }
  0x3d   :  { %1343 = vmatpush.bf16.msra.mxu2 %v3238_v44  ;;  %v5422_v35 = vld [vmem:[#allocation1 + $0x2d] sm:$0xff]  ;;  %v4699_v38 = vld [vmem:[%s7311_s1 + $0x5c4] sm:$0xf]  ;;  %v3670_v41 = vor.u32 %v4667_v32, %v3667_v33 }
  0x3e   :  { %1331 = vmatpush.bf16.msrb.mxu3 %v3094_v49  ;;  %v3795_v39 = vld [vmem:[%s7311_s1 + $0x5d0] sm:$0xf0]  ;;  %v4599_v40 = vld [vmem:[%s7311_s1 + $0x2a4] sm:$0xf] }
  0x3f   :  { %v3395_v42 = vld [vmem:[%s7311_s1 + $0x2b0] sm:$0xf0]  ;;  %v4631_v44 = vld [vmem:[%s7311_s1 + $0x3a4] sm:$0xf]  ;;  %v3798_v48 = vor.u32 %v4699_v38, %v3795_v39 }
  0x40   :  { %1293 = vmatpush.bf16.msrb.mxu0 %v3586_v59  ;;  %1306 = vmatpush.bf16.msrb.mxu1 %v3714_v0  ;;  %v3523_v45 = vld [vmem:[%s7311_s1 + $0x3b0] sm:$0xf0]  ;;  %v4663_v46 = vld [vmem:[%s7311_s1 + $0x4a4] sm:$0xf]  ;;  %v3398_v49 = vor.u32 %v4599_v40, %v3395_v42 }
  0x41   :  { %1344 = vmatpush.bf16.msra.mxu2 %v3222_v58  ;;  %v3651_v47 = vld [vmem:[%s7311_s1 + $0x4b0] sm:$0xf0]  ;;  %v3526_v50 = vor.u32 %v4631_v44, %v3523_v45  ;;  %v4695_v51 = vld [vmem:[%s7311_s1 + $0x5a4] sm:$0xf] }
  0x42   :  { %1332 = vmatpush.bf16.msrb.mxu3 %v3078_v1  ;;  %v3779_v52 = vld [vmem:[%s7311_s1 + $0x5b0] sm:$0xf0]  ;;  %v4595_v54 = vld [vmem:[%s7311_s1 + $0x284] sm:$0xf]  ;;  %v3654_v56 = vor.u32 %v4663_v46, %v3651_v47 }
  0x43   :  { %v3379_v57 = vld [vmem:[%s7311_s1 + $0x290] sm:$0xf0]  ;;  %v4627_v58 = vld [vmem:[%s7311_s1 + $0x384] sm:$0xf]  ;;  %v3782_v63 = vor.u32 %v4695_v51, %v3779_v52  ;;  %v3177_v52 = vld [vmem:[%s7311_s1 + $0xe8] sm:$0xf] }
  0x44   :  { %1294 = vmatpush.bf16.msrb.mxu0 %v3570_v13  ;;  %1307 = vmatpush.bf16.msrb.mxu1 %v3698_v16  ;;  %v3507_v59 = vld [vmem:[%s7311_s1 + $0x390] sm:$0xf0]  ;;  %v4659_v61 = vld [vmem:[%s7311_s1 + $0x484] sm:$0xf]  ;;  %v3382_v0 = vor.u32 %v4595_v54, %v3379_v57  ;;  %v4546_v54 = vld [vmem:[%s7311_s1 + $0xf4] sm:$0xf0] }
  0x45   :  { %1345 = vmatpush.bf16.msra.mxu2 %v3206_v12  ;;  %v3635_v62 = vld [vmem:[%s7311_s1 + $0x490] sm:$0xf0]  ;;  %v3510_v1 = vor.u32 %v4627_v58, %v3507_v59  ;;  %v4691_v2 = vld [vmem:[%s7311_s1 + $0x584] sm:$0xf]  ;;  %v4578_v58 = vld [vmem:[%s7311_s1 + $0x1f4] sm:$0xf0] }
  0x46   :  { %1333 = vmatpush.bf16.msrb.mxu3 %v3062_v17  ;;  %v3763_v3 = vld [vmem:[%s7311_s1 + $0x590] sm:$0xf0]  ;;  %v4591_v4 = vld [vmem:[%s7311_s1 + $0x264] sm:$0xf]  ;;  %v3638_v6 = vor.u32 %v4659_v61, %v3635_v62 }
  0x47   :  { %1295 = vmatmul.bf16.vlgmr.msrb.gmra.mxu0 %v5414_v30  ;;  %1308 = vmatmul.bf16.vlgmr.msrb.gmra.mxu1 %v5422_v35  ;;  %v3363_v7 = vld [vmem:[%s7311_s1 + $0x270] sm:$0xf0]  ;;  %v4623_v8 = vld [vmem:[%s7311_s1 + $0x364] sm:$0xf]  ;;  %v3766_v12 = vor.u32 %v4691_v2, %v3763_v3  ;;  %v3433_v2 = vld [vmem:[%s7311_s1 + $0x2e8] sm:$0xf] }
  0x48   :  { %1352 = vmatpush.bf16.msra.mxu0 %v3430_v20  ;;  %1365 = vmatpush.bf16.msra.mxu1 %v3558_v22  ;;  %v3491_v9 = vld [vmem:[%s7311_s1 + $0x370] sm:$0xf0]  ;;  %v4655_v10 = vld [vmem:[%s7311_s1 + $0x464] sm:$0xf]  ;;  %v3366_v13 = vor.u32 %v4591_v4, %v3363_v7  ;;  %v3178_v4 = vor.u32 %v4546_v54, %v3177_v52  ;;  %v3561_v7 = vld [vmem:[%s7311_s1 + $0x3e8] sm:$0xf] }
  0x49   :  { %1346 = vmatpush.bf16.msra.mxu2 %v3190_v31  ;;  %1334 = vmatmul.bf16.vlgmr.msrb.gmra.mxu3 %v5214_v55  ;;  %v3619_v11 = vld [vmem:[%s7311_s1 + $0x470] sm:$0xf0]  ;;  %v3494_v14 = vor.u32 %v4623_v8, %v3491_v9  ;;  %v4687_v15 = vld [vmem:[%s7311_s1 + $0x564] sm:$0xf]  ;;  %v4642_v8 = vld [vmem:[%s7311_s1 + $0x3f4] sm:$0xf0] }
  0x4a   :  { %1378 = vmatpush.bf16.msra.mxu3 %v3686_v26  ;;  %v3747_v16 = vld [vmem:[%s7311_s1 + $0x570] sm:$0xf0]  ;;  %v4587_v17 = vld [vmem:[%s7311_s1 + $0x244] sm:$0xf]  ;;  %v3622_v18 = vor.u32 %v4655_v10, %v3619_v11  ;;  %v3161_v11 = vld [vmem:[%s7311_s1 + $0xc8] sm:$0xf] }
  0x4b   :  { %v3347_v19 = vld [vmem:[%s7311_s1 + $0x250] sm:$0xf0]  ;;  %v4619_v20 = vld [vmem:[%s7311_s1 + $0x344] sm:$0xf]  ;;  %v3750_v25 = vor.u32 %v4687_v15, %v3747_v16  ;;  %v4574_v15 = vld [vmem:[%s7311_s1 + $0x1d4] sm:$0xf0] }
  0x4c   :  { %1353 = vmatpush.bf16.msra.mxu0 %v3414_v36  ;;  %1366 = vmatpush.bf16.msra.mxu1 %v3542_v37  ;;  %v3475_v22 = vld [vmem:[%s7311_s1 + $0x350] sm:$0xf0]  ;;  %v4651_v23 = vld [vmem:[%s7311_s1 + $0x444] sm:$0xf]  ;;  %v3350_v26 = vor.u32 %v4587_v17, %v3347_v19  ;;  %v3562_v17 = vor.u32 %v4642_v8, %v3561_v7 }
  0x4d   :  { %1391 = vmatpush.bf16.msrb.mxu2 %v3814_v34  ;;  %v3603_v24 = vld [vmem:[%s7311_s1 + $0x450] sm:$0xf0]  ;;  %v3478_v27 = vor.u32 %v4619_v20, %v3475_v22  ;;  %v4683_v28 = vld [vmem:[%s7311_s1 + $0x544] sm:$0xf]  ;;  %v4606_v20 = vld [vmem:[%s7311_s1 + $0x2d4] sm:$0xf0] }
  0x4e   :  { %1379 = vmatpush.bf16.msra.mxu3 %v3670_v41  ;;  %1347 = vmatmul.bf16.vlgmr.msra.gmra.mxu2 %v5245_v5  ;;  %v3731_v29 = vld [vmem:[%s7311_s1 + $0x550] sm:$0xf0]  ;;  %v4583_v31 = vld [vmem:[%s7311_s1 + $0x224] sm:$0xf]  ;;  %v3606_v32 = vor.u32 %v4651_v23, %v3603_v24  ;;  %v3545_v22 = vld [vmem:[%s7311_s1 + $0x3c8] sm:$0xf] }
  0x4f   :  { %v3331_v33 = vld [vmem:[%s7311_s1 + $0x230] sm:$0xf0]  ;;  %v4615_v34 = vld [vmem:[%s7311_s1 + $0x324] sm:$0xf]  ;;  %v3734_v39 = vor.u32 %v4683_v28, %v3731_v29  ;;  %v4638_v23 = vld [vmem:[%s7311_s1 + $0x3d4] sm:$0xf0] }
  0x50   :  { %1354 = vmatpush.bf16.msra.mxu0 %v3398_v49  ;;  %1367 = vmatpush.bf16.msra.mxu1 %v3526_v50  ;;  %v3459_v36 = vld [vmem:[%s7311_s1 + $0x330] sm:$0xf0]  ;;  %v4647_v37 = vld [vmem:[%s7311_s1 + $0x424] sm:$0xf]  ;;  %v3334_v42 = vor.u32 %v4583_v31, %v3331_v33  ;;  %v4570_v28 = vld [vmem:[%s7311_s1 + $0x1b4] sm:$0xf0]  ;;  %v3546_v31 = vor.u32 %v4638_v23, %v3545_v22 }
  0x51   :  { %1392 = vmatpush.bf16.msrb.mxu2 %v3798_v48  ;;  %v3587_v38 = vld [vmem:[%s7311_s1 + $0x430] sm:$0xf0]  ;;  %v4679_v40 = vld [vmem:[%s7311_s1 + $0x524] sm:$0xf]  ;;  %v3462_v44 = vor.u32 %v4615_v34, %v3459_v36  ;;  %v4602_v33 = vld [vmem:[%s7311_s1 + $0x2b4] sm:$0xf0] }
  0x52   :  { %1380 = vmatpush.bf16.msra.mxu3 %v3654_v56  ;;  %v3715_v41 = vld [vmem:[%s7311_s1 + $0x530] sm:$0xf0]  ;;  %v4579_v45 = vld [vmem:[%s7311_s1 + $0x204] sm:$0xf]  ;;  %v3590_v48 = vor.u32 %v4647_v37, %v3587_v38  ;;  %v3305_v56 = vld [vmem:[%s7311_s1 + $0x1e8] sm:$0xf] }
  0x53   :  { %v3315_v46 = vld [vmem:[%s7311_s1 + $0x210] sm:$0xf0]  ;;  %v4611_v47 = vld [vmem:[%s7311_s1 + $0x304] sm:$0xf]  ;;  %v3718_v57 = vor.u32 %v4679_v40, %v3715_v41  ;;  %v3306_v9 = vor.u32 %v4578_v58, %v3305_v56  ;;  %v3529_v34 = vld [vmem:[%s7311_s1 + $0x3a8] sm:$0xf] }
  0x54   :  { %1355 = vmatpush.bf16.msra.mxu0 %v3382_v0  ;;  %1368 = vmatpush.bf16.msra.mxu1 %v3510_v1  ;;  %v3443_v49 = vld [vmem:[%s7311_s1 + $0x310] sm:$0xf0]  ;;  %v4643_v50 = vld [vmem:[%s7311_s1 + $0x404] sm:$0xf]  ;;  %v3318_v62 = vor.u32 %v4579_v45, %v3315_v46  ;;  %v4634_v37 = vld [vmem:[%s7311_s1 + $0x3b4] sm:$0xf0] }
  0x55   :  { %1393 = vmatpush.bf16.msrb.mxu2 %v3782_v63  ;;  %v3571_v51 = vld [vmem:[%s7311_s1 + $0x410] sm:$0xf0]  ;;  %v4707_v59 = vld [vmem:[%s7311_s1 + $0x604] sm:$0xf]  ;;  %v3446_v63 = vor.u32 %v4611_v47, %v3443_v49  ;;  %v4534_v40 = vld [vmem:[%s7311_s1 + $0x94] sm:$0xf0] }
  0x56   :  { %1381 = vmatpush.bf16.msra.mxu3 %v3638_v6  ;;  %v3827_v61 = vld [vmem:[%s7311_s1 + $0x610] sm:$0xf0]  ;;  %v4675_v0 = vld [vmem:[%s7311_s1 + $0x504] sm:$0xf]  ;;  %v3574_v3 = vor.u32 %v4643_v50, %v3571_v51  ;;  %v4610_v6 = vld [vmem:[%s7311_s1 + $0x2f4] sm:$0xf0] }
  0x57   :  { %v3699_v1 = vld [vmem:[%s7311_s1 + $0x510] sm:$0xf0]  ;;  %v3830_v10 = vor.u32 %v4707_v59, %v3827_v61  ;;  %v3434_v16 = vor.u32 %v4610_v6, %v3433_v2 }
  0x58   :  { %1356 = vmatpush.bf16.msra.mxu0 %v3366_v13  ;;  %1369 = vmatpush.bf16.msra.mxu1 %v3494_v14  ;;  %v3702_v13 = vor.u32 %v4675_v0, %v3699_v1  ;;  %v3289_v14 = vld [vmem:[%s7311_s1 + $0x1c8] sm:$0xf] }
  0x59   :  { %1394 = vmatpush.bf16.msrb.mxu2 %v3766_v12  ;;  %v4542_v12 = vld [vmem:[%s7311_s1 + $0xd4] sm:$0xf0]  ;;  %v3290_v24 = vor.u32 %v4574_v15, %v3289_v14 }
  0x5a   :  { %1382 = vmatpush.bf16.msra.mxu3 %v3622_v18  ;;  %v3417_v18 = vld [vmem:[%s7311_s1 + $0x2c8] sm:$0xf]  ;;  %v3162_v19 = vor.u32 %v4542_v12, %v3161_v11 }
  0x5b   :  { %v3418_v29 = vor.u32 %v4606_v20, %v3417_v18 }
  0x5c   :  { %1357 = vmatpush.bf16.msra.mxu0 %v3350_v26  ;;  %1370 = vmatpush.bf16.msra.mxu1 %v3478_v27  ;;  %v4538_v26 = vld [vmem:[%s7311_s1 + $0xb4] sm:$0xf0]  ;;  %v3273_v27 = vld [vmem:[%s7311_s1 + $0x1a8] sm:$0xf] }
  0x5d   :  { %1395 = vmatpush.bf16.msrb.mxu2 %v3750_v25  ;;  %v3145_v25 = vld [vmem:[%s7311_s1 + $0xa8] sm:$0xf]  ;;  %v3274_v38 = vor.u32 %v4570_v28, %v3273_v27 }
  0x5e   :  { %1383 = vmatpush.bf16.msra.mxu3 %v3606_v32  ;;  %v3401_v32 = vld [vmem:[%s7311_s1 + $0x2a8] sm:$0xf]  ;;  %v3146_v36 = vor.u32 %v4538_v26, %v3145_v25 }
  0x60   :  { %1358 = vmatpush.bf16.msra.mxu0 %v3334_v42  ;;  %1371 = vmatpush.bf16.msra.mxu1 %v3462_v44 }
  0x61   :  { %1396 = vmatpush.bf16.msrb.mxu2 %v3734_v39  ;;  %v3129_v39 = vld [vmem:[%s7311_s1 + $0x88] sm:$0xf] }
  0x62   :  { %1384 = vmatpush.bf16.msra.mxu3 %v3590_v48 }
  0x64   :  { %1359 = vmatpush.bf16.msra.mxu0 %v3318_v62  ;;  %1372 = vmatpush.bf16.msra.mxu1 %v3446_v63 }
  0x65   :  { %1397 = vmatpush.bf16.msrb.mxu2 %v3718_v57 }
  0x66   :  { %1385 = vmatpush.bf16.msra.mxu3 %v3574_v3 }
  0x67   :  { %1360 = vmatmul.bf16.vlgmr.msra.gmra.mxu0 %v5212_v53 }
  0x68   :  { %1417 = vmatpush.bf16.msrb.mxu1 %v3178_v4  ;;  %1411 = vmatpush.bf16.msrb.mxu0 %v3830_v10 }
  0x69   :  { %1398 = vmatpush.bf16.msrb.mxu2 %v3702_v13  ;;  %1386 = vmatmul.bf16.vlgmr.msra.gmra.mxu3 %v5414_v30 }
  0x6a   :  { %1430 = vmatpush.bf16.msrb.mxu3 %v3306_v9 }
  0x6c   :  { %1443 = vmatpush.bf16.msra.mxu0 %v3434_v16  ;;  %1418 = vmatpush.bf16.msrb.mxu1 %v3162_v19 }
  0x6d   :  { %1456 = vmatpush.bf16.msra.mxu2 %v3562_v17 }
  0x6e   :  { %1431 = vmatpush.bf16.msrb.mxu3 %v3290_v24  ;;  %1399 = vmatmul.bf16.vlgmr.msrb.gmra.mxu2 %v5422_v35 }
  0x6f   :  { %14 = vsyncpa [#allocation4], 0  ;;  %1373 = vmatmul.bf16.vlgmr.msra.gmra.mxu1 %v5222_v60  ;;  %v3257_v41 = vld [vmem:[%s7311_s1 + $0x188] sm:$0xf]  ;;  %v4566_v42 = vld [vmem:[%s7311_s1 + $0x194] sm:$0xf0]  ;;  %v3402_v44 = vor.u32 %v4602_v33, %v3401_v32  ;;  %v3530_v45 = vor.u32 %v4634_v37, %v3529_v34  ;;  %v3130_v47 = vor.u32 %v4534_v40, %v3129_v39 }
  0x70   :  { %1444 = vmatpush.bf16.msra.mxu0 %v3418_v29  ;;  %v3385_v46 = vld [vmem:[%s7311_s1 + $0x288] sm:$0xf]  ;;  %1419 = vmatpush.bf16.msrb.mxu1 %v3146_v36  ;;  %v4598_v48 = vld [vmem:[%s7311_s1 + $0x294] sm:$0xf0]  ;;  %v3258_v51 = vor.u32 %v4566_v42, %v3257_v41  ;;  %vm1608_vm1 = vcmask 1041408   ;;  %vm3023_vm2 = vcmask 1045508  }
  0x71   :  { %1457 = vmatpush.bf16.msra.mxu2 %v3546_v31  ;;  %v3513_v49 = vld [vmem:[%s7311_s1 + $0x388] sm:$0xf]  ;;  %v4630_v50 = vld [vmem:[%s7311_s1 + $0x394] sm:$0xf0]  ;;  %v3386_v58 = vor.u32 %v4598_v48, %v3385_v46  ;;  %vm3025_vm3 = vcmask 1043456   ;;  %vm3034_vm4 = vcmask 1043458  }
  0x72   :  { %1432 = vmatpush.bf16.msrb.mxu3 %v3274_v38  ;;  %v3113_v52 = vld [vmem:[%s7311_s1 + $0x68] sm:$0xf]  ;;  %v4530_v54 = vld [vmem:[%s7311_s1 + $0x74] sm:$0xf0]  ;;  %v3514_v59 = vor.u32 %v4630_v50, %v3513_v49  ;;  %v3179_v50 = vld [vmem:[%s7311_s1 + $0xf8] sm:$0xf0] }
  0x73   :  { %v3241_v56 = vld [vmem:[%s7311_s1 + $0x168] sm:$0xf]  ;;  %v4562_v57 = vld [vmem:[%s7311_s1 + $0x174] sm:$0xf0]  ;;  %v3114_v62 = vor.u32 %v4530_v54, %v3113_v52  ;;  %vm3035_vm5 = vmor %vm3034_vm4, %vm1608_vm1  ;;  %vm3036_vm6 = vcmask 128004   ;;  %s3046_s24 = sshll.u32 %s7317_s7, 4  ;;  %s3047_s24 = int_to_ptr.hbm [resolvable:$true] %s3046_s24 }
  0x74   :  { %1445 = vmatpush.bf16.msra.mxu0 %v3402_v44  ;;  %v3369_v61 = vld [vmem:[%s7311_s1 + $0x268] sm:$0xf]  ;;  %1420 = vmatpush.bf16.msrb.mxu1 %v3130_v47  ;;  %v4594_v63 = vld [vmem:[%s7311_s1 + $0x274] sm:$0xf0]  ;;  %v3242_v2 = vor.u32 %v4562_v57, %v3241_v56  ;;  %v4544_v47 = vld [vmem:[%s7311_s1 + $0xec] sm:$0xf] }
  0x75   :  { %1458 = vmatpush.bf16.msra.mxu2 %v3530_v45  ;;  %v3497_v0 = vld [vmem:[%s7311_s1 + $0x368] sm:$0xf]  ;;  %v4626_v1 = vld [vmem:[%s7311_s1 + $0x374] sm:$0xf0]  ;;  %v3370_v8 = vor.u32 %v4594_v63, %v3369_v61  ;;  %v3182_v63 = vor.u32 %v4544_v47, %v3179_v50  ;;  %v4560_v50 = vld [vmem:[%s7311_s1 + $0x16c] sm:$0xf] }
  0x76   :  { %1433 = vmatpush.bf16.msrb.mxu3 %v3258_v51  ;;  %v3097_v3 = vld [vmem:[%s7311_s1 + $0x48] sm:$0xf]  ;;  %v4526_v4 = vld [vmem:[%s7311_s1 + $0x54] sm:$0xf0]  ;;  %v3498_v9 = vor.u32 %v4626_v1, %v3497_v0  ;;  %v4576_v1 = vld [vmem:[%s7311_s1 + $0x1ec] sm:$0xf] }
  0x77   :  { %v3225_v6 = vld [vmem:[%s7311_s1 + $0x148] sm:$0xf]  ;;  %v4558_v7 = vld [vmem:[%s7311_s1 + $0x154] sm:$0xf0]  ;;  %v3098_v11 = vor.u32 %v4526_v4, %v3097_v3  ;;  %3840 = vmatmul.msk.bf16.vlgmr.msrb.gmra.mxu0 %vm1232_vm0, %v5320_v43  ;;  %v4540_v4 = vld [vmem:[%s7311_s1 + $0xcc] sm:$0xf] }
  0x78   :  { %1446 = vmatpush.bf16.msra.mxu0 %v3386_v58  ;;  %v3353_v10 = vld [vmem:[%s7311_s1 + $0x248] sm:$0xf]  ;;  %1421 = vmatpush.bf16.msrb.mxu1 %v3114_v62  ;;  %v4590_v12 = vld [vmem:[%s7311_s1 + $0x254] sm:$0xf0]  ;;  %v3226_v15 = vor.u32 %v4558_v7, %v3225_v6  ;;  %v3163_v6 = vld [vmem:[%s7311_s1 + $0xd8] sm:$0xf0] }
  0x79   :  { %1459 = vmatpush.bf16.msra.mxu2 %v3514_v59  ;;  %v3481_v13 = vld [vmem:[%s7311_s1 + $0x348] sm:$0xf]  ;;  %v4622_v14 = vld [vmem:[%s7311_s1 + $0x354] sm:$0xf0]  ;;  %v3354_v20 = vor.u32 %v4590_v12, %v3353_v10  ;;  %vm3037_vm7 = vmor %vm3036_vm6, %vm3035_vm5 }
  0x7a   :  { %1434 = vmatpush.bf16.msrb.mxu3 %v3242_v2  ;;  %v3081_v16 = vld [vmem:[%s7311_s1 + $0x28] sm:$0xf]  ;;  %v4522_v17 = vld [vmem:[%s7311_s1 + $0x34] sm:$0xf0]  ;;  %v3482_v22 = vor.u32 %v4622_v14, %v3481_v13  ;;  %v3307_v2 = vld [vmem:[%s7311_s1 + $0x1f8] sm:$0xf0]  ;;  %v3166_v13 = vor.u32 %v4540_v4, %v3163_v6 }
  0x7b   :  { %v3209_v18 = vld [vmem:[%s7311_s1 + $0x128] sm:$0xf]  ;;  %v4554_v19 = vld [vmem:[%s7311_s1 + $0x134] sm:$0xf0]  ;;  %v3082_v25 = vor.u32 %v4522_v17, %v3081_v16  ;;  %v3310_v10 = vor.u32 %v4576_v1, %v3307_v2  ;;  %v4572_v14 = vld [vmem:[%s7311_s1 + $0x1cc] sm:$0xf] }
  0x7c   :  { %1447 = vmatpush.bf16.msra.mxu0 %v3370_v8  ;;  %v3337_v23 = vld [vmem:[%s7311_s1 + $0x228] sm:$0xf]  ;;  %v4586_v24 = vld [vmem:[%s7311_s1 + $0x234] sm:$0xf0]  ;;  %1422 = vmatpush.bf16.msrb.mxu1 %v3098_v11  ;;  %v3210_v29 = vor.u32 %v4554_v19, %v3209_v18  ;;  %v4536_v17 = vld [vmem:[%s7311_s1 + $0xac] sm:$0xf] }
  0x7d   :  { %1460 = vmatpush.bf16.msra.mxu2 %v3498_v9  ;;  %v3465_v26 = vld [vmem:[%s7311_s1 + $0x328] sm:$0xf]  ;;  %v4618_v27 = vld [vmem:[%s7311_s1 + $0x334] sm:$0xf0]  ;;  %v3338_v38 = vor.u32 %v4586_v24, %v3337_v23  ;;  %v3147_v18 = vld [vmem:[%s7311_s1 + $0xb8] sm:$0xf0] }
  0x7e   :  { %v3065_v28 = vld [vmem:[%s7311_s1 + $0x8] sm:$0xf]  ;;  %1435 = vmatpush.bf16.msrb.mxu3 %v3226_v15  ;;  %v4518_v31 = vld [vmem:[%s7311_s1 + $0x14] sm:$0xf0]  ;;  %v3466_v39 = vor.u32 %v4618_v27, %v3465_v26  ;;  %v3291_v15 = vld [vmem:[%s7311_s1 + $0x1d8] sm:$0xf0]  ;;  %v3150_v24 = vor.u32 %v4536_v17, %v3147_v18 }
  0x7f   :  { %v3193_v32 = vld [vmem:[%s7311_s1 + $0x108] sm:$0xf]  ;;  %v4550_v33 = vld [vmem:[%s7311_s1 + $0x114] sm:$0xf0]  ;;  %v3066_v44 = vor.u32 %v4518_v31, %v3065_v28  ;;  %v3275_v26 = vld [vmem:[%s7311_s1 + $0x1b8] sm:$0xf0] }
  0x80   :  { %v3689_v34 = vld [vmem:[%s7311_s1 + $0x4e8] sm:$0xf]  ;;  %v4674_v36 = vld [vmem:[%s7311_s1 + $0x4f4] sm:$0xf0]  ;;  %1448 = vmatpush.bf16.msra.mxu0 %v3354_v20  ;;  %1423 = vmatpush.bf16.msrb.mxu1 %v3082_v25  ;;  %v3194_v48 = vor.u32 %v4550_v33, %v3193_v32  ;;  %v4568_v25 = vld [vmem:[%s7311_s1 + $0x1ac] sm:$0xf] }
  0x81   :  { %v3817_v37 = vld [vmem:[%s7311_s1 + $0x5e8] sm:$0xf]  ;;  %1461 = vmatpush.bf16.msra.mxu2 %v3482_v22  ;;  %v4706_v40 = vld [vmem:[%s7311_s1 + $0x5f4] sm:$0xf0]  ;;  %v3690_v49 = vor.u32 %v4674_v36, %v3689_v34  ;;  %v3294_v22 = vor.u32 %v4572_v14, %v3291_v15  ;;  %v4532_v27 = vld [vmem:[%s7311_s1 + $0x8c] sm:$0xf] }
  0x82   :  { %v3321_v41 = vld [vmem:[%s7311_s1 + $0x208] sm:$0xf]  ;;  %v4582_v42 = vld [vmem:[%s7311_s1 + $0x214] sm:$0xf0]  ;;  %1436 = vmatpush.bf16.msrb.mxu3 %v3210_v29  ;;  %v3818_v54 = vor.u32 %v4706_v40, %v3817_v37  ;;  %v3131_v28 = vld [vmem:[%s7311_s1 + $0x98] sm:$0xf0] }
  0x83   :  { %v3449_v45 = vld [vmem:[%s7311_s1 + $0x308] sm:$0xf]  ;;  %v4614_v46 = vld [vmem:[%s7311_s1 + $0x314] sm:$0xf0]  ;;  %v3322_v58 = vor.u32 %v4582_v42, %v3321_v41  ;;  %v3134_v36 = vor.u32 %v4532_v27, %v3131_v28  ;;  %v4564_v37 = vld [vmem:[%s7311_s1 + $0x18c] sm:$0xf] }
  0x84   :  { %v3833_v51 = vld [vmem:[%s7311_s1 + $0x608] sm:$0xf]  ;;  %v4710_v52 = vld [vmem:[%s7311_s1 + $0x614] sm:$0xf0]  ;;  %1449 = vmatpush.bf16.msra.mxu0 %v3338_v38  ;;  %v3450_v59 = vor.u32 %v4614_v46, %v3449_v45  ;;  %1424 = vmatpush.bf16.msrb.mxu1 %v3066_v44  ;;  %v3259_v38 = vld [vmem:[%s7311_s1 + $0x198] sm:$0xf0] }
  0x85   :  { %v3673_v56 = vld [vmem:[%s7311_s1 + $0x4c8] sm:$0xf]  ;;  %v4670_v57 = vld [vmem:[%s7311_s1 + $0x4d4] sm:$0xf0]  ;;  %1462 = vmatpush.bf16.msra.mxu2 %v3466_v39  ;;  %v3834_v0 = vor.u32 %v4710_v52, %v3833_v51  ;;  %v4528_v40 = vld [vmem:[%s7311_s1 + $0x6c] sm:$0xf]  ;;  %v3262_v46 = vor.u32 %v4564_v37, %v3259_v38 }
  0x86   :  { %v3801_v61 = vld [vmem:[%s7311_s1 + $0x5c8] sm:$0xf]  ;;  %v4702_v62 = vld [vmem:[%s7311_s1 + $0x5d4] sm:$0xf0]  ;;  %1437 = vmatpush.bf16.msrb.mxu3 %v3194_v48  ;;  %v3674_v3 = vor.u32 %v4670_v57, %v3673_v56  ;;  %v3115_v41 = vld [vmem:[%s7311_s1 + $0x78] sm:$0xf0] }
  0x87   :  { %v3802_v7 = vor.u32 %v4702_v62, %v3801_v61  ;;  %v3657_v8 = vld [vmem:[%s7311_s1 + $0x4a8] sm:$0xf]  ;;  %v4666_v9 = vld [vmem:[%s7311_s1 + $0x4b4] sm:$0xf0]  ;;  %1425 = vmatmul.bf16.vlgmr.msrb.gmra.mxu1 %v5214_v55  ;;  %v3243_v51 = vld [vmem:[%s7311_s1 + $0x178] sm:$0xf0] }
  0x88   :  { %1469 = vmatpush.bf16.msra.mxu1 %v3690_v49  ;;  %1450 = vmatpush.bf16.msra.mxu0 %v3322_v58  ;;  %v3785_v11 = vld [vmem:[%s7311_s1 + $0x5a8] sm:$0xf]  ;;  %v4698_v12 = vld [vmem:[%s7311_s1 + $0x5b4] sm:$0xf0]  ;;  %v3658_v16 = vor.u32 %v4666_v9, %v3657_v8  ;;  %v3118_v49 = vor.u32 %v4528_v40, %v3115_v41  ;;  %v3099_v56 = vld [vmem:[%s7311_s1 + $0x58] sm:$0xf0]  ;;  %v3246_v61 = vor.u32 %v4560_v50, %v3243_v51 }
  0x89   :  { %1463 = vmatpush.bf16.msra.mxu2 %v3450_v59  ;;  %1438 = vmatmul.bf16.vlgmr.msrb.gmra.mxu3 %v5245_v5  ;;  %v3786_v19 = vor.u32 %v4698_v12, %v3785_v11  ;;  %v3641_v20 = vld [vmem:[%s7311_s1 + $0x488] sm:$0xf]  ;;  %v4662_v5 = vld [vmem:[%s7311_s1 + $0x494] sm:$0xf0]  ;;  %v4556_v1 = vld [vmem:[%s7311_s1 + $0x14c] sm:$0xf] }
  0x8a   :  { %1482 = vmatpush.bf16.msra.mxu3 %v3818_v54  ;;  %v3769_v23 = vld [vmem:[%s7311_s1 + $0x588] sm:$0xf]  ;;  %v3642_v55 = vor.u32 %v4662_v5, %v3641_v20  ;;  %v4658_v32 = vld [vmem:[%s7311_s1 + $0x474] sm:$0xf0]  ;;  %v4524_v54 = vld [vmem:[%s7311_s1 + $0x4c] sm:$0xf] }
  0x8b   :  { %1451 = vmatmul.bf16.vlgmr.msra.gmra.mxu0 %v5212_v53  ;;  %v4694_v53 = vld [vmem:[%s7311_s1 + $0x594] sm:$0xf0]  ;;  %v3625_v31 = vld [vmem:[%s7311_s1 + $0x468] sm:$0xf]  ;;  %v3227_v2 = vld [vmem:[%s7311_s1 + $0x158] sm:$0xf0] }
  0x8c   :  { %1502 = vmatpush.bf16.msrb.mxu0 %v3834_v0  ;;  %1470 = vmatpush.bf16.msra.mxu1 %v3674_v3  ;;  %v3770_v29 = vor.u32 %v4694_v53, %v3769_v23  ;;  %v3753_v33 = vld [vmem:[%s7311_s1 + $0x568] sm:$0xf]  ;;  %v4690_v34 = vld [vmem:[%s7311_s1 + $0x574] sm:$0xf0]  ;;  %v3626_v39 = vor.u32 %v4658_v32, %v3625_v31  ;;  %v3102_v0 = vor.u32 %v4524_v54, %v3099_v56  ;;  %v4520_v4 = vld [vmem:[%s7311_s1 + $0x2c] sm:$0xf] }
  0x8d   :  { %1508 = vmatpush.bf16.msrb.mxu2 %v3182_v63  ;;  %v3754_v42 = vor.u32 %v4690_v34, %v3753_v33  ;;  %v3609_v44 = vld [vmem:[%s7311_s1 + $0x448] sm:$0xf]  ;;  %v4654_v45 = vld [vmem:[%s7311_s1 + $0x454] sm:$0xf0]  ;;  %v3083_v6 = vld [vmem:[%s7311_s1 + $0x38] sm:$0xf0]  ;;  %v3230_v12 = vor.u32 %v4556_v1, %v3227_v2 }
  0x8e   :  { %1483 = vmatpush.bf16.msra.mxu3 %v3802_v7  ;;  %1464 = vmatmul.bf16.vlgmr.msra.gmra.mxu2 %v5222_v60  ;;  %v3278_v60 = vor.u32 %v4568_v25, %v3275_v26  ;;  %v3737_v47 = vld [vmem:[%s7311_s1 + $0x548] sm:$0xf]  ;;  %v4686_v48 = vld [vmem:[%s7311_s1 + $0x554] sm:$0xf0]  ;;  %v3610_v52 = vor.u32 %v4654_v45, %v3609_v44  ;;  %v3435_v14 = vld [vmem:[%s7311_s1 + $0x2f8] sm:$0xf0] }
  0x8f   :  { %v3738_v57 = vor.u32 %v4686_v48, %v3737_v47  ;;  %v3593_v58 = vld [vmem:[%s7311_s1 + $0x428] sm:$0xf]  ;;  %v4650_v59 = vld [vmem:[%s7311_s1 + $0x434] sm:$0xf0]  ;;  %v4640_v15 = vld [vmem:[%s7311_s1 + $0x3ec] sm:$0xf] }
  0x90   :  { %1521 = vmatpush.bf16.msra.mxu0 %v3310_v10  ;;  %1471 = vmatpush.bf16.msra.mxu1 %v3658_v16  ;;  %v3721_v62 = vld [vmem:[%s7311_s1 + $0x528] sm:$0xf]  ;;  %v4682_v63 = vld [vmem:[%s7311_s1 + $0x534] sm:$0xf0]  ;;  %v3594_v3 = vor.u32 %v4650_v59, %v3593_v58  ;;  %v3086_v16 = vor.u32 %v4520_v4, %v3083_v6  ;;  %v4552_v17 = vld [vmem:[%s7311_s1 + $0x12c] sm:$0xf] }
  0x91   :  { %1509 = vmatpush.bf16.msrb.mxu2 %v3166_v13  ;;  %v3577_v7 = vld [vmem:[%s7311_s1 + $0x408] sm:$0xf]  ;;  %v3722_v8 = vor.u32 %v4682_v63, %v3721_v62  ;;  %v4646_v9 = vld [vmem:[%s7311_s1 + $0x414] sm:$0xf0]  ;;  %v4608_v13 = vld [vmem:[%s7311_s1 + $0x2ec] sm:$0xf] }
  0x92   :  { %1484 = vmatpush.bf16.msra.mxu3 %v3786_v19  ;;  %v3705_v10 = vld [vmem:[%s7311_s1 + $0x508] sm:$0xf]  ;;  %v4678_v11 = vld [vmem:[%s7311_s1 + $0x514] sm:$0xf0]  ;;  %v3211_v18 = vld [vmem:[%s7311_s1 + $0x138] sm:$0xf0]  ;;  %v3578_v19 = vor.u32 %v4646_v9, %v3577_v7  ;;  %v3438_v23 = vor.u32 %v4608_v13, %v3435_v14 }
  0x93   :  { %v4516_v20 = vld [vmem:[%s7311_s1 + $0xc] sm:$0xf]  ;;  %v3067_v5 = vld [vmem:[%s7311_s1 + $0x18] sm:$0xf0]  ;;  %v3214_v26 = vor.u32 %v4552_v17, %v3211_v18 }
  0x94   :  { %1522 = vmatpush.bf16.msra.mxu0 %v3294_v22  ;;  %1472 = vmatpush.bf16.msra.mxu1 %v3642_v55  ;;  %v3706_v22 = vor.u32 %v4678_v11, %v3705_v10  ;;  %v4672_v53 = vld [vmem:[%s7311_s1 + $0x4ec] sm:$0xf]  ;;  %v3419_v27 = vld [vmem:[%s7311_s1 + $0x2d8] sm:$0xf0] }
  0x95   :  { %1510 = vmatpush.bf16.msrb.mxu2 %v3150_v24  ;;  %v3691_v24 = vld [vmem:[%s7311_s1 + $0x4f8] sm:$0xf0]  ;;  %v4604_v55 = vld [vmem:[%s7311_s1 + $0x2cc] sm:$0xf] }
  0x96   :  { %1485 = vmatpush.bf16.msra.mxu3 %v3770_v29  ;;  %v4636_v28 = vld [vmem:[%s7311_s1 + $0x3cc] sm:$0xf]  ;;  %v3070_v29 = vor.u32 %v4516_v20, %v3067_v5  ;;  %v3547_v31 = vld [vmem:[%s7311_s1 + $0x3d8] sm:$0xf0]  ;;  %v3694_v33 = vor.u32 %v4672_v53, %v3691_v24  ;;  %v3422_v37 = vor.u32 %v4604_v55, %v3419_v27  ;;  %v6127_v55 = vld [vmem:[%s7312_s2] sm:$0xf] }
  0x97   :  { %v4548_v32 = vld [vmem:[%s7311_s1 + $0x10c] sm:$0xf]  ;;  %v3550_v40 = vor.u32 %v4636_v28, %v3547_v31  ;;  %v3403_v44 = vld [vmem:[%s7311_s1 + $0x2b8] sm:$0xf0] }
  0x98   :  { %1523 = vmatpush.bf16.msra.mxu0 %v3278_v60  ;;  %1473 = vmatpush.bf16.msra.mxu1 %v3626_v39  ;;  %v3195_v60 = vld [vmem:[%s7311_s1 + $0x118] sm:$0xf0]  ;;  %v4704_v34 = vld [vmem:[%s7311_s1 + $0x5ec] sm:$0xf] }
  0x99   :  { %1511 = vmatpush.bf16.msrb.mxu2 %v3134_v36  ;;  %v3819_v36 = vld [vmem:[%s7311_s1 + $0x5f8] sm:$0xf0]  ;;  %v4668_v38 = vld [vmem:[%s7311_s1 + $0x4cc] sm:$0xf]  ;;  %v3198_v41 = vor.u32 %v4548_v32, %v3195_v60 }
  0x9a   :  { %1486 = vmatpush.bf16.msra.mxu3 %v3754_v42  ;;  %v3675_v39 = vld [vmem:[%s7311_s1 + $0x4d8] sm:$0xf0]  ;;  %v4600_v42 = vld [vmem:[%s7311_s1 + $0x2ac] sm:$0xf]  ;;  %v3822_v45 = vor.u32 %v4704_v34, %v3819_v36 }
  0x9b   :  { %3841 = vmatmul.msk.bf16.vlgmr.msrb.gmra.mxu0 %vm1232_vm0, %v5320_v43  ;;  %v3563_v43 = vld [vmem:[%s7311_s1 + $0x3f8] sm:$0xf0]  ;;  %v3678_v48 = vor.u32 %v4668_v38, %v3675_v39  ;;  %v3406_v50 = vor.u32 %v4600_v42, %v3403_v44  ;;  %v4664_v51 = vld [vmem:[%s7311_s1 + $0x4ac] sm:$0xf] }
  0x9c   :  { %1524 = vmatpush.bf16.msra.mxu0 %v3262_v46  ;;  %1474 = vmatpush.bf16.msra.mxu1 %v3610_v52  ;;  %v3566_v25 = vor.u32 %v4640_v15, %v3563_v43  ;;  %v4632_v46 = vld [vmem:[%s7311_s1 + $0x3ac] sm:$0xf]  ;;  %v3531_v47 = vld [vmem:[%s7311_s1 + $0x3b8] sm:$0xf0] }
  0x9d   :  { %1512 = vmatpush.bf16.msrb.mxu2 %v3118_v49  ;;  %v4700_v49 = vld [vmem:[%s7311_s1 + $0x5cc] sm:$0xf]  ;;  %v3534_v52 = vor.u32 %v4632_v46, %v3531_v47  ;;  %v3387_v56 = vld [vmem:[%s7311_s1 + $0x298] sm:$0xf0] }
  0x9e   :  { %1487 = vmatpush.bf16.msra.mxu3 %v3738_v57  ;;  %v4596_v54 = vld [vmem:[%s7311_s1 + $0x28c] sm:$0xf]  ;;  %v3515_v59 = vld [vmem:[%s7311_s1 + $0x398] sm:$0xf0] }
  0x9f   :  { %v4628_v58 = vld [vmem:[%s7311_s1 + $0x38c] sm:$0xf]  ;;  %v3390_v1 = vor.u32 %v4596_v54, %v3387_v56  ;;  %v3499_v11 = vld [vmem:[%s7311_s1 + $0x378] sm:$0xf0] }
  0xa0   :  { %1525 = vmatpush.bf16.msra.mxu0 %v3246_v61  ;;  %1475 = vmatpush.bf16.msra.mxu1 %v3594_v3  ;;  %v4888_v61 = vld [vmem:[#allocation1] sm:$0xff]  ;;  %v4696_v63 = vld [vmem:[%s7311_s1 + $0x5ac] sm:$0xf]  ;;  %v3643_v3 = vld [vmem:[%s7311_s1 + $0x498] sm:$0xf0]  ;;  %v3518_v6 = vor.u32 %v4628_v58, %v3515_v59 }
  0xa1   :  { %1513 = vmatpush.bf16.msrb.mxu2 %v3102_v0  ;;  %v3787_v0 = vld [vmem:[%s7311_s1 + $0x5b8] sm:$0xf0]  ;;  %v4660_v2 = vld [vmem:[%s7311_s1 + $0x48c] sm:$0xf] }
  0xa2   :  { %1488 = vmatpush.bf16.msra.mxu3 %v3722_v8  ;;  %v4889_v4 = vld [vmem:[#allocation1 + $0x9] sm:$0xff]  ;;  %v3371_v8 = vld [vmem:[%s7311_s1 + $0x278] sm:$0xf0]  ;;  %v3790_v9 = vor.u32 %v4696_v63, %v3787_v0  ;;  %v3646_v13 = vor.u32 %v4660_v2, %v3643_v3 }
  0xa3   :  { %v4592_v7 = vld [vmem:[%s7311_s1 + $0x26c] sm:$0xf]  ;;  %v3771_v15 = vld [vmem:[%s7311_s1 + $0x598] sm:$0xf0] }
  0xa4   :  { %1526 = vmatpush.bf16.msra.mxu0 %v3230_v12  ;;  %1476 = vmatpush.bf16.msra.mxu1 %v3578_v19  ;;  %v4624_v10 = vld [vmem:[%s7311_s1 + $0x36c] sm:$0xf]  ;;  %v3627_v17 = vld [vmem:[%s7311_s1 + $0x478] sm:$0xf0] }
  0xa5   :  { %1514 = vmatpush.bf16.msrb.mxu2 %v3086_v16  ;;  %v4692_v14 = vld [vmem:[%s7311_s1 + $0x58c] sm:$0xf]  ;;  %v3374_v16 = vor.u32 %v4592_v7, %v3371_v8  ;;  %v3502_v18 = vor.u32 %v4624_v10, %v3499_v11  ;;  %v3355_v20 = vld [vmem:[%s7311_s1 + $0x258] sm:$0xf0] }
  0xa6   :  { %1489 = vmatpush.bf16.msra.mxu3 %v3706_v22  ;;  %v4656_v43 = vld [vmem:[%s7311_s1 + $0x46c] sm:$0xf]  ;;  %v3774_v5 = vor.u32 %v4692_v14, %v3771_v15  ;;  %v3483_v53 = vld [vmem:[%s7311_s1 + $0x358] sm:$0xf0]  ;;  %v4013_v15 = vld [vmem:[%s7315_s5 + $0x150] sm:$0xf] }
  0xa7   :  { %1477 = vmatmul.bf16.vlgmr.msra.gmra.mxu1 %v5414_v30  ;;  %v3803_v30 = vld [vmem:[%s7311_s1 + $0x5d8] sm:$0xf0]  ;;  %v4588_v19 = vld [vmem:[%s7311_s1 + $0x24c] sm:$0xf]  ;;  %v3630_v24 = vor.u32 %v4656_v43, %v3627_v17 }
  0xa8   :  { %1534 = vmatpush.bf16.msrb.mxu1 %v3438_v23  ;;  %1527 = vmatpush.bf16.msra.mxu0 %v3214_v26  ;;  %v3806_v57 = vor.u32 %v4700_v49, %v3803_v30  ;;  %v6090_v12 = vpop.f32.mrf.mxu0  ;;  %v4620_v23 = vld [vmem:[%s7311_s1 + $0x34c] sm:$0xf]  ;;  %v3755_v26 = vld [vmem:[%s7311_s1 + $0x578] sm:$0xf0]  ;;  %v3358_v28 = vor.u32 %v4588_v19, %v3355_v20 }
  0xa9   :  { %1515 = vmatpush.bf16.msrb.mxu2 %v3070_v29  ;;  %1490 = vmatmul.bf16.vlgmr.msra.gmra.mxu3 %v5422_v35  ;;  %v3659_v35 = vld [vmem:[%s7311_s1 + $0x4b8] sm:$0xf0]  ;;  %v4652_v29 = vld [vmem:[%s7311_s1 + $0x44c] sm:$0xf]  ;;  %v3486_v32 = vor.u32 %v4620_v23, %v3483_v53  ;;  %v4753_v53 = vld [vmem:[%s7315_s5 + $0x154] sm:$0xf] }
  0xaa   :  { %1547 = vmatpush.bf16.msrb.mxu3 %v3566_v25  ;;  %v3662_v62 = vor.u32 %v4664_v51, %v3659_v35  ;;  %v6110_v22 = vpop.f32.mrf.mxu1  ;;  %v4688_v25 = vld [vmem:[%s7311_s1 + $0x56c] sm:$0xf]  ;;  %v3611_v31 = vld [vmem:[%s7311_s1 + $0x458] sm:$0xf0] }
  0xab   :  { %v3339_v34 = vld [vmem:[%s7311_s1 + $0x238] sm:$0xf0]  ;;  %v3758_v36 = vor.u32 %v4688_v25, %v3755_v26  ;;  %v4684_v42 = vld [vmem:[%s7311_s1 + $0x54c] sm:$0xf]  ;;  %v4892_v25 = vld [vmem:[#allocation1 + $0x24] sm:$0xff] }
  0xac   :  { %1535 = vmatpush.bf16.msrb.mxu1 %v3422_v37  ;;  %1528 = vmatpush.bf16.msra.mxu0 %v3198_v41  ;;  %v4616_v37 = vld [vmem:[%s7311_s1 + $0x32c] sm:$0xf]  ;;  %v3467_v38 = vld [vmem:[%s7311_s1 + $0x338] sm:$0xf0]  ;;  %v3614_v41 = vor.u32 %v4652_v29, %v3611_v31  ;;  %v4749_v29 = vld [vmem:[%s7315_s5 + $0x130] sm:$0xf0] }
  0xad   :  { %1560 = vmatpush.bf16.msra.mxu2 %v3694_v33  ;;  %v6129_v27 = vpop.f32.mrf.mxu2  ;;  %v4584_v33 = vld [vmem:[%s7311_s1 + $0x22c] sm:$0xf]  ;;  %v3739_v44 = vld [vmem:[%s7311_s1 + $0x558] sm:$0xf0]  ;;  %v3470_v49 = vor.u32 %v4616_v37, %v3467_v38 }
  0xae   :  { %1548 = vmatpush.bf16.msrb.mxu3 %v3550_v40  ;;  %1516 = vmatmul.bf16.vlgmr.msrb.gmra.mxu2 %v4888_v61  ;;  %v6137_v60 = vpop.f32.mrf.mxu3  ;;  %v229_v40 = vperm.slane %v6127_v55, 0  ;;  %v4648_v46 = vld [vmem:[%s7311_s1 + $0x42c] sm:$0xf]  ;;  %v3595_v47 = vld [vmem:[%s7311_s1 + $0x438] sm:$0xf0]  ;;  %v3742_v35 = vor.u32 %v4684_v42, %v3739_v44 }
  0xaf   :  { %1529 = vmatmul.bf16.vlgmr.msra.gmra.mxu0 %v4889_v4  ;;  %v3323_v30 = vld [vmem:[%s7311_s1 + $0x218] sm:$0xf0]  ;;  %v4708_v56 = vld [vmem:[%s7311_s1 + $0x60c] sm:$0xf]  ;;  %v3598_v58 = vor.u32 %v4648_v46, %v3595_v47  ;;  %v4041_v61 = vld [vmem:[%s7315_s5 + $0x188] sm:$0xf] }
  0xb0   :  { %1573 = vmatpush.bf16.msrb.mxu0 %v3822_v45  ;;  %1536 = vmatpush.bf16.msrb.mxu1 %v3406_v50  ;;  %v1246_v39 = vpop.f32.mrf.mxu0  ;;  %v3342_v45 = vor.u32 %v4584_v33, %v3339_v34  ;;  %v4612_v50 = vld [vmem:[%s7311_s1 + $0x30c] sm:$0xf]  ;;  %v3451_v51 = vld [vmem:[%s7311_s1 + $0x318] sm:$0xf0]  ;;  %v1245_v7 = vadd.f32 %v6090_v12, %v229_v40  ;;  %v4043_v12 = vld [vmem:[%s7315_s5 + $0x1a4] sm:$0xf0] }
  0xb1   :  { %1561 = vmatpush.bf16.msra.mxu2 %v3678_v48  ;;  %v4580_v48 = vld [vmem:[%s7311_s1 + $0x20c] sm:$0xf]  ;;  %v3723_v59 = vld [vmem:[%s7311_s1 + $0x538] sm:$0xf0]  ;;  %v3454_v3 = vor.u32 %v4612_v50, %v3451_v51  ;;  %v4882_v50 = vld [vmem:[%s7313_s3] ss:$0 sm:$0xff] }
  0xb2   :  { %1549 = vmatpush.bf16.msrb.mxu3 %v3534_v52  ;;  %v4680_v52 = vld [vmem:[%s7311_s1 + $0x52c] sm:$0xf]  ;;  %v1259_v54 = vpop.f32.mrf.mxu1  ;;  %v3326_v0 = vor.u32 %v4580_v48, %v3323_v30  ;;  %v3579_v2 = vld [vmem:[%s7311_s1 + $0x418] sm:$0xf0]  ;;  %v1258_v43 = vadd.f32 %v6110_v22, %v1245_v7  ;;  %v3929_v48 = vld [vmem:[%s7315_s5 + $0xa8] sm:$0xf] }
  0xb3   :  { %v3726_v8 = vor.u32 %v4680_v52, %v3723_v59  ;;  %v4676_v11 = vld [vmem:[%s7311_s1 + $0x50c] sm:$0xf]  ;;  %v4742_v37 = vld [vmem:[%s7315_s5 + $0xf8] sm:$0xf0]  ;;  %v3931_v52 = vld [vmem:[%s7315_s5 + $0xc4] sm:$0xf0] }
  0xb4   :  { %1574 = vmatpush.bf16.msrb.mxu0 %v3806_v57  ;;  %1537 = vmatpush.bf16.msrb.mxu1 %v3390_v1  ;;  %v3835_v57 = vld [vmem:[%s7311_s1 + $0x618] sm:$0xf0]  ;;  %v4644_v1 = vld [vmem:[%s7311_s1 + $0x40c] sm:$0xf]  ;;  %v1271_v22 = vadd.f32 %v6129_v27, %v1258_v43  ;;  %v3987_v27 = vld [vmem:[%s7315_s5 + $0x134] sm:$0xf0] }
  0xb5   :  { %1562 = vmatpush.bf16.msra.mxu2 %v3662_v62  ;;  %v4763_v62 = vld [vmem:[%s7315_s5 + $0x1a0] sm:$0xf0]  ;;  %v1272_v63 = vpop.f32.mrf.mxu2  ;;  %v3838_v4 = vor.u32 %v4708_v56, %v3835_v57  ;;  %v3582_v10 = vor.u32 %v4644_v1, %v3579_v2  ;;  %v4760_v14 = vld [vmem:[%s7315_s5 + $0x18c] sm:$0xf]  ;;  %v3901_v56 = vld [vmem:[%s7315_s5 + $0x70] sm:$0xf] }
  0xb6   :  { %1550 = vmatpush.bf16.msrb.mxu3 %v3518_v6  ;;  %v1285_v6 = vpop.f32.mrf.mxu3  ;;  %v4046_v19 = vor.u32 %v4760_v14, %v4043_v12  ;;  %v4893_v33 = vld [vmem:[#allocation1 + $0x2d] sm:$0xff]  ;;  %v1284_v34 = vadd.f32 %v6137_v60, %v1271_v22  ;;  %v4739_v60 = vld [vmem:[%s7315_s5 + $0xe4] sm:$0xf] }
  0xb7   :  { %v4728_v57 = vld [vmem:[%s7315_s5 + $0x88] sm:$0xf0]  ;;  %v4725_v2 = vld [vmem:[%s7315_s5 + $0x74] sm:$0xf] }
  0xb8   :  { %1575 = vmatpush.bf16.msrb.mxu0 %v3790_v9  ;;  %1538 = vmatpush.bf16.msrb.mxu1 %v3374_v16  ;;  %v4042_v9 = vor.u32 %v4763_v62, %v4041_v61  ;;  %v4756_v16 = vld [vmem:[%s7315_s5 + $0x168] sm:$0xf0]  ;;  %v3902_v1 = vor.u32 %v4728_v57, %v3901_v56 }
  0xb9   :  { %1563 = vmatpush.bf16.msra.mxu2 %v3646_v13  ;;  %v3707_v13 = vld [vmem:[%s7311_s1 + $0x518] sm:$0xf0]  ;;  %v4014_v20 = vor.u32 %v4756_v16, %v4013_v15  ;;  %v3845_v15 = vld [vmem:[%s7315_s5] sm:$0xf] }
  0xba   :  { %1551 = vmatpush.bf16.msrb.mxu3 %v3502_v18  ;;  %v3710_v17 = vor.u32 %v4676_v11, %v3707_v13  ;;  %v4890_v18 = vld [vmem:[#allocation1 + $0x12] sm:$0xff]  ;;  %v4718_v11 = vld [vmem:[%s7315_s5 + $0x3c] sm:$0xf] }
  0xbb   :  { %v3875_v13 = vld [vmem:[%s7315_s5 + $0x54] sm:$0xf0]  ;;  %v4714_v16 = vld [vmem:[%s7315_s5 + $0x18] sm:$0xf0] }
  0xbc   :  { %1576 = vmatpush.bf16.msrb.mxu0 %v3774_v5  ;;  %1539 = vmatpush.bf16.msrb.mxu1 %v3358_v28  ;;  %v4891_v5 = vld [vmem:[#allocation1 + $0x1b] sm:$0xff]  ;;  %v3878_v12 = vor.u32 %v4718_v11, %v3875_v13  ;;  %v3846_v43 = vor.u32 %v4714_v16, %v3845_v15  ;;  %v4125_v16 = vld [vmem:[%s7315_s5 + $0x230] sm:$0xf] }
  0xbd   :  { %1564 = vmatpush.bf16.msra.mxu2 %v3630_v24  ;;  %v1322_v23 = vpop.f32.mrf.mxu2  ;;  %v4015_v24 = vld [vmem:[%s7315_s5 + $0x16c] sm:$0xf0]  ;;  %v3985_v28 = vld [vmem:[%s7315_s5 + $0x118] sm:$0xf] }
  0xbe   :  { %1552 = vmatpush.bf16.msrb.mxu3 %v3486_v32  ;;  %v4018_v26 = vor.u32 %v4753_v53, %v4015_v24  ;;  %v3986_v31 = vor.u32 %v4749_v29, %v3985_v28  ;;  %v4746_v32 = vld [vmem:[%s7315_s5 + $0x11c] sm:$0xf]  ;;  %v4816_v53 = vld [vmem:[%s7315_s5 + $0x34c] sm:$0xf] }
  0xbf   :  { %v3990_v39 = vor.u32 %v4746_v32, %v3987_v27  ;;  %v4820_v28 = vld [vmem:[%s7315_s5 + $0x368] sm:$0xf0]  ;;  %v4237_v32 = vld [vmem:[%s7315_s5 + $0x310] sm:$0xf] }
  0xc0   :  { %1577 = vmatpush.bf16.msrb.mxu0 %v3758_v36  ;;  %1540 = vmatpush.bf16.msrb.mxu1 %v3342_v45  ;;  %v3957_v36 = vld [vmem:[%s7315_s5 + $0xe0] sm:$0xf]  ;;  %v4812_v27 = vld [vmem:[%s7315_s5 + $0x328] sm:$0xf0] }
  0xc1   :  { %1565 = vmatpush.bf16.msra.mxu2 %v3614_v41  ;;  %v3958_v40 = vor.u32 %v4742_v37, %v3957_v36  ;;  %v3959_v45 = vld [vmem:[%s7315_s5 + $0xfc] sm:$0xf0]  ;;  %v4238_v36 = vor.u32 %v4812_v27, %v4237_v32  ;;  %v4239_v37 = vld [vmem:[%s7315_s5 + $0x32c] sm:$0xf0]  ;;  %v4778_v32 = vld [vmem:[%s7315_s5 + $0x218] sm:$0xf0] }
  0xc2   :  { %1553 = vmatpush.bf16.msrb.mxu3 %v3470_v49  ;;  %v3962_v47 = vor.u32 %v4739_v60, %v3959_v45  ;;  %v4735_v49 = vld [vmem:[%s7315_s5 + $0xc0] sm:$0xf0]  ;;  %v4211_v45 = vld [vmem:[%s7315_s5 + $0x2f4] sm:$0xf0] }
  0xc3   :  { %v3930_v51 = vor.u32 %v4735_v49, %v3929_v48  ;;  %v4806_v48 = vld [vmem:[%s7315_s5 + $0x2f8] sm:$0xf0] }
  0xc4   :  { %1578 = vmatpush.bf16.msrb.mxu0 %v3742_v35  ;;  %1541 = vmatpush.bf16.msrb.mxu1 %v3326_v0  ;;  %v1296_v38 = vpop.f32.mrf.mxu0  ;;  %v1309_v42 = vpop.f32.mrf.mxu1  ;;  %v4732_v35 = vld [vmem:[%s7315_s5 + $0xac] sm:$0xf] }
  0xc5   :  { %1566 = vmatpush.bf16.msra.mxu2 %v3598_v58  ;;  %v1297_v41 = vadd.f32 %v1296_v38, %v1284_v34  ;;  %v1324_v44 = vpop.f32.mrf.mxu2  ;;  %v4894_v58 = vld [vmem:[#allocation1 + $0x36] sm:$0xff]  ;;  %v3934_v62 = vor.u32 %v4732_v35, %v3931_v52  ;;  %v4181_v35 = vld [vmem:[%s7315_s5 + $0x2a0] sm:$0xf] }
  0xc6   :  { %1554 = vmatpush.bf16.msrb.mxu3 %v3454_v3  ;;  %v3903_v3 = vld [vmem:[%s7315_s5 + $0x8c] sm:$0xf0]  ;;  %v4245_v38 = vld [vmem:[%s7315_s5 + $0x318] sm:$0xf]  ;;  %v4802_v44 = vld [vmem:[%s7315_s5 + $0x2dc] sm:$0xf] }
  0xc7   :  { %1542 = vmatmul.bf16.vlgmr.msrb.gmra.mxu1 %v4890_v18  ;;  %v1310_v46 = vadd.f32 %v1309_v42, %v1297_v41  ;;  %v3906_v7 = vor.u32 %v4725_v2, %v3903_v3  ;;  %v3847_v18 = vld [vmem:[%s7315_s5 + $0x1c] sm:$0xf0]  ;;  %v4209_v41 = vld [vmem:[%s7315_s5 + $0x2d8] sm:$0xf]  ;;  %v4805_v42 = vld [vmem:[%s7315_s5 + $0x2f0] sm:$0xf0] }
  0xc8   :  { %1593 = vmatpush.bf16.msra.mxu1 %v3838_v4  ;;  %1579 = vmatpush.bf16.msrb.mxu0 %v3726_v8  ;;  %v3873_v8 = vld [vmem:[%s7315_s5 + $0x38] sm:$0xf]  ;;  %v4798_v52 = vld [vmem:[%s7315_s5 + $0x2b8] sm:$0xf0]  ;;  %v4153_v2 = vld [vmem:[%s7315_s5 + $0x268] sm:$0xf] }
  0xc9   :  { %1567 = vmatpush.bf16.msra.mxu2 %v3582_v10  ;;  %1555 = vmatmul.bf16.vlgmr.msrb.gmra.mxu3 %v4891_v5  ;;  %v1323_v30 = vadd.f32 %v1322_v23, %v1310_v46  ;;  %v4265_v5 = vld [vmem:[%s7315_s5 + $0x348] sm:$0xf]  ;;  %v4819_v23 = vld [vmem:[%s7315_s5 + $0x360] sm:$0xf0]  ;;  %v4210_v46 = vor.u32 %v4805_v42, %v4209_v41  ;;  %v4182_v57 = vor.u32 %v4798_v52, %v4181_v35 }
  0xca   :  { %2697 = vmatpush.bf16.msra.mxu3 %v4042_v9  ;;  %v4721_v9 = vld [vmem:[%s7315_s5 + $0x50] sm:$0xf0]  ;;  %v4266_v22 = vor.u32 %v4819_v23, %v4265_v5  ;;  %v4791_v3 = vld [vmem:[%s7315_s5 + $0x280] sm:$0xf0] }
  0xcb   :  { %v1599_v54 = vmax.f32 %v1323_v30, 0.0  ;;  %v3874_v10 = vor.u32 %v4721_v9, %v3873_v8  ;;  %v4214_v30 = vor.u32 %v4802_v44, %v4211_v45  ;;  %v4161_v8 = vld [vmem:[%s7315_s5 + $0x270] sm:$0xf]  ;;  %v4792_v9 = vld [vmem:[%s7315_s5 + $0x288] sm:$0xf0] }
  0xcc   :  { %1568 = vmatmul.bf16.vlgmr.msra.gmra.mxu2 %v4892_v25  ;;  %1580 = vmatpush.bf16.msrb.mxu0 %v3710_v17  ;;  %v1298_v59 = vpop.f32.mrf.mxu0  ;;  %v1335_v61 = vpop.f32.mrf.mxu3  ;;  %v4711_v17 = vld [vmem:[%s7315_s5 + $0x4] sm:$0xf]  ;;  %v4267_v25 = vld [vmem:[%s7315_s5 + $0x364] sm:$0xf0]  ;;  %v4162_v11 = vor.u32 %v4792_v9, %v4161_v8  ;;  %v4785_v5 = vld [vmem:[%s7315_s5 + $0x250] sm:$0xf0] }
  0xcd   :  { %v1607_v63 = vmul.f32 %v4882_v50, %v1599_v54  ;;  %v1311_v0 = vpop.f32.mrf.mxu1  ;;  %v3850_v24 = vor.u32 %v4711_v17, %v3847_v18  ;;  %v4270_v29 = vor.u32 %v4816_v53, %v4267_v25  ;;  %2710 = vmatpush.bf16.msrb.mxu1 %v4266_v22  ;;  %v4795_v54 = vld [vmem:[%s7315_s5 + $0x2a4] sm:$0xf]  ;;  %v4189_v59 = vld [vmem:[%s7315_s5 + $0x2a8] sm:$0xf]  ;;  %v4781_v17 = vld [vmem:[%s7315_s5 + $0x234] sm:$0xf] }
  0xce   :  { %2698 = vmatpush.bf16.msra.mxu3 %v4014_v20  ;;  %v4777_v22 = vld [vmem:[%s7315_s5 + $0x210] sm:$0xf0]  ;;  %v4774_v25 = vld [vmem:[%s7315_s5 + $0x1fc] sm:$0xf]  ;;  %v4872_v44 = vld [vmem:[%s7315_s5 + $0x50c] sm:$0xf] }
  0xcf   :  { %1581 = vmatmul.bf16.vlgmr.msrb.gmra.mxu0 %v4893_v33  ;;  %v1609_v6 = vsel %vm1608_vm1, %v1607_v63, 0.0  ;;  %v4809_v33 = vld [vmem:[%s7315_s5 + $0x314] sm:$0xf]  ;;  %v4077_v45 = vld [vmem:[%s7315_s5 + $0x1c8] sm:$0xf] }
  0xd0   :  { %2736 = vmatpush.bf16.msra.mxu0 %v4046_v19  ;;  %1610 = vadd.xlane.f32.xlu0 %v1609_v6  ;;  %v230_v19 = vperm.slane %v6127_v55, 1  ;;  %v4154_v6 = vor.u32 %v4791_v3, %v4153_v2  ;;  %v4869_v8 = vld [vmem:[%s7315_s5 + $0x4f0] sm:$0xf0]  ;;  %v4866_v9 = vld [vmem:[%s7315_s5 + $0x4dc] sm:$0xf] }
  0xd1   :  { %v1348_v4 = vpop.f32.mrf.mxu2  ;;  %2711 = vmatpush.bf16.msrb.mxu1 %v4238_v36  ;;  %v4770_v36 = vld [vmem:[%s7315_s5 + $0x1d8] sm:$0xf0] }
  0xd2   :  { %2699 = vmatpush.bf16.msra.mxu3 %v3986_v31  ;;  %v1336_v34 = vadd.f32 %v1335_v61, %v230_v19  ;;  %v4799_v61 = vld [vmem:[%s7315_s5 + $0x2c0] sm:$0xf0]  ;;  %v4127_v19 = vld [vmem:[%s7315_s5 + $0x24c] sm:$0xf0] }
  0xd3   :  { %v4190_v63 = vor.u32 %v4799_v61, %v4189_v59  ;;  %v4130_v23 = vor.u32 %v4781_v17, %v4127_v19  ;;  %v4868_v59 = vld [vmem:[%s7315_s5 + $0x4e8] sm:$0xf0]  ;;  %v4865_v61 = vld [vmem:[%s7315_s5 + $0x4d4] sm:$0xf]  ;;  %v4435_v17 = vld [vmem:[%s7315_s5 + $0x4b4] sm:$0xf0] }
  0xd4   :  { %2737 = vmatpush.bf16.msra.mxu0 %v4018_v26  ;;  %v1337_v14 = vpop.f32.mrf.mxu3  ;;  %v4273_v26 = vld [vmem:[%s7315_s5 + $0x350] sm:$0xf]  ;;  %v1349_v49 = vadd.f32 %v1348_v4, %v1336_v34  ;;  %v4788_v4 = vld [vmem:[%s7315_s5 + $0x26c] sm:$0xf]  ;;  %v4069_v34 = vld [vmem:[%s7315_s5 + $0x1c0] sm:$0xf] }
  0xd5   :  { %v4274_v31 = vor.u32 %v4820_v28, %v4273_v26  ;;  %2712 = vmatpush.bf16.msrb.mxu1 %v4210_v46  ;;  %v4862_v19 = vld [vmem:[%s7315_s5 + $0x4b8] sm:$0xf0] }
  0xd6   :  { %2700 = vmatpush.bf16.msra.mxu3 %v3958_v40  ;;  %v4242_v40 = vor.u32 %v4809_v33, %v4239_v37  ;;  %v4767_v37 = vld [vmem:[%s7315_s5 + $0x1c4] sm:$0xf] }
  0xd7   :  { %3842 = vmatmul.msk.bf16.vlgmr.msra.gmra.mxu1 %vm1232_vm0, %v4894_v58  ;;  %v4183_v58 = vld [vmem:[%s7315_s5 + $0x2bc] sm:$0xf0] }
  0xd8   :  { %2738 = vmatpush.bf16.msra.mxu0 %v3990_v39  ;;  %v4813_v39 = vld [vmem:[%s7315_s5 + $0x330] sm:$0xf0] }
  0xd9   :  { %v1350_v20 = vpop.f32.mrf.mxu2  ;;  %v4246_v60 = vor.u32 %v4813_v39, %v4245_v38  ;;  %2713 = vmatpush.bf16.msrb.mxu1 %v4182_v57  ;;  %v4071_v38 = vld [vmem:[%s7315_s5 + $0x1dc] sm:$0xf0]  ;;  %v4489_v39 = vld [vmem:[%s7315_s5 + $0x508] sm:$0xf]  ;;  %v4499_v57 = vld [vmem:[%s7315_s5 + $0x52c] sm:$0xf0] }
  0xda   :  { %2701 = vmatpush.bf16.msra.mxu3 %v3930_v51  ;;  %v4133_v20 = vld [vmem:[%s7315_s5 + $0x238] sm:$0xf]  ;;  %v4074_v52 = vor.u32 %v4767_v37, %v4071_v38  ;;  %v4415_v37 = vld [vmem:[%s7315_s5 + $0x484] sm:$0xf0] }
  0xdb   :  { %v4134_v53 = vor.u32 %v4785_v5, %v4133_v20 }
  0xdc   :  { %2739 = vmatpush.bf16.msra.mxu0 %v3962_v47  ;;  %v4217_v47 = vld [vmem:[%s7315_s5 + $0x2e0] sm:$0xf] }
  0xdd   :  { %v4218_v50 = vor.u32 %v4806_v48, %v4217_v47  ;;  %2714 = vmatpush.bf16.msrb.mxu1 %v4154_v6  ;;  %v4070_v48 = vor.u32 %v4770_v36, %v4069_v34  ;;  %v4852_v36 = vld [vmem:[%s7315_s5 + $0x46c] sm:$0xf] }
  0xde   :  { %2702 = vmatpush.bf16.msra.mxu3 %v3902_v1 }
  0xe0   :  { %2740 = vmatpush.bf16.msra.mxu0 %v3934_v62  ;;  %v4186_v62 = vor.u32 %v4795_v54, %v4183_v58  ;;  %v4461_v58 = vld [vmem:[%s7315_s5 + $0x4d0] sm:$0xf] }
  0xe2   :  { %2703 = vmatpush.bf16.msra.mxu3 %v3874_v10 }
  0xe4   :  { %2741 = vmatpush.bf16.msra.mxu0 %v3906_v7  ;;  %v1361_v51 = vpop.f32.mrf.mxu0  ;;  %v4155_v7 = vld [vmem:[%s7315_s5 + $0x284] sm:$0xf0] }
  0xe5   :  { %v1362_v56 = vadd.f32 %v1361_v51, %v1349_v49  ;;  %v4158_v10 = vor.u32 %v4788_v4, %v4155_v7  ;;  %v4771_v49 = vld [vmem:[%s7315_s5 + $0x1e0] sm:$0xf0]  ;;  %v4469_v7 = vld [vmem:[%s7315_s5 + $0x4d8] sm:$0xf] }
  0xe6   :  { %2704 = vmatpush.bf16.msra.mxu3 %v3846_v43  ;;  %v4784_v43 = vld [vmem:[%s7315_s5 + $0x248] sm:$0xf0] }
  0xe7   :  { %v4126_v18 = vor.u32 %v4784_v43, %v4125_v16  ;;  %v4858_v16 = vld [vmem:[%s7315_s5 + $0x49c] sm:$0xf] }
  0xe8   :  { %2742 = vmatpush.bf16.msra.mxu0 %v3878_v12  ;;  %v4438_v20 = vor.u32 %v4858_v16, %v4435_v17  ;;  %v4834_v16 = vld [vmem:[%s7315_s5 + $0x3d8] sm:$0xf0]  ;;  %v4331_v17 = vld [vmem:[%s7315_s5 + $0x3dc] sm:$0xf0] }
  0xe9   :  { %2715 = vmatpush.bf16.msrb.mxu1 %v4126_v18  ;;  %v4441_v18 = vld [vmem:[%s7315_s5 + $0x4a0] sm:$0xf] }
  0xea   :  { %2749 = vmatpush.bf16.msrb.mxu3 %v4270_v29  ;;  %v4099_v29 = vld [vmem:[%s7315_s5 + $0x214] sm:$0xf0]  ;;  %v4442_v5 = vor.u32 %v4862_v19, %v4441_v18 }
  0xeb   :  { %v4102_v33 = vor.u32 %v4774_v25, %v4099_v29  ;;  %v4854_v25 = vld [vmem:[%s7315_s5 + $0x478] sm:$0xf0]  ;;  %v4407_v29 = vld [vmem:[%s7315_s5 + $0x47c] sm:$0xf0] }
  0xec   :  { %2743 = vmatpush.bf16.msra.mxu0 %v3850_v24  ;;  %v1374_v0 = vpop.f32.mrf.mxu1  ;;  %v1363_v13 = vpop.f32.mrf.mxu0  ;;  %v4097_v24 = vld [vmem:[%s7315_s5 + $0x1f8] sm:$0xf] }
  0xed   :  { %v1375_v1 = vadd.f32 %v1374_v0, %v1362_v56  ;;  %v1387_v14 = vpop.f32.mrf.mxu3  ;;  %v4098_v28 = vor.u32 %v4777_v22, %v4097_v24  ;;  %v4873_v56 = vld [vmem:[%s7315_s5 + $0x514] sm:$0xf]  ;;  %v4462_v0 = vor.u32 %v4868_v59, %v4461_v58  ;;  %v4470_v13 = vor.u32 %v4869_v8, %v4469_v7  ;;  %v4405_v22 = vld [vmem:[%s7315_s5 + $0x460] sm:$0xf]  ;;  %v4357_v58 = vld [vmem:[%s7315_s5 + $0x3f8] sm:$0xf] }
  0xee   :  { %2750 = vmatpush.bf16.msrb.mxu3 %v4242_v40  ;;  %v4875_v40 = vld [vmem:[%s7315_s5 + $0x520] sm:$0xf0]  ;;  %v4502_v4 = vor.u32 %v4873_v56, %v4499_v57  ;;  %v4351_v57 = vld [vmem:[%s7315_s5 + $0x40c] sm:$0xf0]  ;;  %v4841_v59 = vld [vmem:[%s7315_s5 + $0x410] sm:$0xf0] }
  0xef   :  { %v1388_v12 = vadd.f32 %v1387_v14, %v1375_v1  ;;  %v4490_v42 = vor.u32 %v4875_v40, %v4489_v39  ;;  %2716 = vmatpush.bf16.msrb.mxu1 %v4098_v28  ;;  %v4078_v1 = vor.u32 %v4771_v49, %v4077_v45  ;;  %v4406_v28 = vor.u32 %v4854_v25, %v4405_v22  ;;  %v4377_v40 = vld [vmem:[%s7315_s5 + $0x428] sm:$0xf]  ;;  %v4385_v45 = vld [vmem:[%s7315_s5 + $0x430] sm:$0xf]  ;;  %v4845_v49 = vld [vmem:[%s7315_s5 + $0x434] sm:$0xf] }
  0xf0   :  { %2788 = vmatpush.bf16.msrb.mxu0 %v4274_v31  ;;  %v4105_v31 = vld [vmem:[%s7315_s5 + $0x200] sm:$0xf]  ;;  %v4418_v39 = vor.u32 %v4852_v36, %v4415_v37  ;;  %v231_v7 = vperm.slane %v6127_v55, 2  ;;  %v4321_v8 = vld [vmem:[%s7315_s5 + $0x3b8] sm:$0xf] }
  0xf1   :  { %v1400_v15 = vpop.f32.mrf.mxu2  ;;  %v4106_v41 = vor.u32 %v4778_v32, %v4105_v31  ;;  %2723 = vmatpush.bf16.msrb.mxu2 %v4490_v42  ;;  %v4413_v31 = vld [vmem:[%s7315_s5 + $0x468] sm:$0xf]  ;;  %v4855_v32 = vld [vmem:[%s7315_s5 + $0x480] sm:$0xf0]  ;;  %v4844_v42 = vld [vmem:[%s7315_s5 + $0x42c] sm:$0xf] }
  0xf2   :  { %2751 = vmatpush.bf16.msrb.mxu3 %v4214_v30  ;;  %v1401_v27 = vadd.f32 %v1400_v15, %v1388_v12  ;;  %v4497_v30 = vld [vmem:[%s7315_s5 + $0x510] sm:$0xf]  ;;  %v4433_v12 = vld [vmem:[%s7315_s5 + $0x498] sm:$0xf]  ;;  %v4861_v15 = vld [vmem:[%s7315_s5 + $0x4b0] sm:$0xf0]  ;;  %v4414_v34 = vor.u32 %v4855_v32, %v4413_v31 }
  0xf3   :  { %2717 = vmatpush.bf16.msrb.mxu1 %v4070_v48  ;;  %v4434_v43 = vor.u32 %v4861_v15, %v4433_v12  ;;  %v4301_v22 = vld [vmem:[%s7315_s5 + $0x388] sm:$0xf]  ;;  %v4827_v25 = vld [vmem:[%s7315_s5 + $0x3a0] sm:$0xf0]  ;;  %v4049_v31 = vld [vmem:[%s7315_s5 + $0x190] sm:$0xf] }
  0xf4   :  { %2789 = vmatpush.bf16.msrb.mxu0 %v4246_v60  ;;  %v1376_v26 = vpop.f32.mrf.mxu1  ;;  %v4491_v60 = vld [vmem:[%s7315_s5 + $0x524] sm:$0xf0]  ;;  %v1413_v46 = vpop.f32.mrf.mxu0  ;;  %v4764_v32 = vld [vmem:[%s7315_s5 + $0x1a8] sm:$0xf0] }
  0xf5   :  { %v1389_v47 = vpop.f32.mrf.mxu3  ;;  %v1414_v51 = vadd.f32 %v1413_v46, %v1401_v27  ;;  %v4494_v54 = vor.u32 %v4872_v44, %v4491_v60  ;;  %2724 = vmatpush.bf16.msrb.mxu2 %v4462_v0  ;;  %v4851_v26 = vld [vmem:[%s7315_s5 + $0x464] sm:$0xf]  ;;  %v4379_v60 = vld [vmem:[%s7315_s5 + $0x444] sm:$0xf0]  ;;  %v4848_v46 = vld [vmem:[%s7315_s5 + $0x448] sm:$0xf0] }
  0xf6   :  { %2752 = vmatpush.bf16.msrb.mxu3 %v4186_v62  ;;  %v4463_v62 = vld [vmem:[%s7315_s5 + $0x4ec] sm:$0xf0]  ;;  %v4382_v47 = vor.u32 %v4844_v42, %v4379_v60  ;;  %v4386_v48 = vor.u32 %v4848_v46, %v4385_v45  ;;  %v4838_v0 = vld [vmem:[%s7315_s5 + $0x3fc] sm:$0xf]  ;;  %v4824_v36 = vld [vmem:[%s7315_s5 + $0x38c] sm:$0xf] }
  0xf7   :  { %2762 = vmatpush.bf16.msra.mxu1 %v4494_v54  ;;  %v4466_v6 = vor.u32 %v4865_v61, %v4463_v62  ;;  %v4837_v54 = vld [vmem:[%s7315_s5 + $0x3f4] sm:$0xf]  ;;  %v4303_v37 = vld [vmem:[%s7315_s5 + $0x3a4] sm:$0xf0]  ;;  %v4750_v46 = vld [vmem:[%s7315_s5 + $0x138] sm:$0xf0] }
  0xf8   :  { %2790 = vmatpush.bf16.msrb.mxu0 %v4218_v50  ;;  %v4876_v50 = vld [vmem:[%s7315_s5 + $0x528] sm:$0xf0]  ;;  %v4354_v62 = vor.u32 %v4837_v54, %v4351_v57  ;;  %v4757_v42 = vld [vmem:[%s7315_s5 + $0x170] sm:$0xf0] }
  0xf9   :  { %v1402_v35 = vpop.f32.mrf.mxu2  ;;  %v4498_v2 = vor.u32 %v4876_v50, %v4497_v30  ;;  %2725 = vmatpush.bf16.msrb.mxu2 %v4434_v43  ;;  %v4387_v30 = vld [vmem:[%s7315_s5 + $0x44c] sm:$0xf0]  ;;  %v4831_v43 = vld [vmem:[%s7315_s5 + $0x3c4] sm:$0xf] }
  0xfa   :  { %2753 = vmatpush.bf16.msrb.mxu3 %v4158_v10  ;;  %v4471_v10 = vld [vmem:[%s7315_s5 + $0x4f4] sm:$0xf0]  ;;  %v4349_v35 = vld [vmem:[%s7315_s5 + $0x3f0] sm:$0xf]  ;;  %v4334_v19 = vor.u32 %v4831_v43, %v4331_v17 }
  0xfb   :  { %2763 = vmatpush.bf16.msra.mxu1 %v4466_v6  ;;  %v4474_v14 = vor.u32 %v4866_v9, %v4471_v10  ;;  %v4833_v9 = vld [vmem:[%s7315_s5 + $0x3d0] sm:$0xf0] }
  0xfc   :  { %2791 = vmatpush.bf16.msrb.mxu0 %v4190_v63  ;;  %v1600_v63 = vmax.f32 %v1414_v51, 0.0  ;;  %v4390_v51 = vor.u32 %v4845_v49, %v4387_v30  ;;  %v4322_v10 = vor.u32 %v4833_v9, %v4321_v8  ;;  %v3965_v30 = vld [vmem:[%s7315_s5 + $0xe8] sm:$0xf]  ;;  %v4762_v8 = vld [vmem:[%s7315_s5 + $0x19c] sm:$0xf] }
  0xfd   :  { %2726 = vmatpush.bf16.msrb.mxu2 %v4406_v28  ;;  %v4059_v9 = vld [vmem:[%s7315_s5 + $0x1b4] sm:$0xf0] }
  0xfe   :  { %2754 = vmatpush.bf16.msrb.mxu3 %v4130_v23  ;;  %v6486_v3 = vpack.c.bf16 %v1600_v63, %v1600_v63  ;;  %v4859_v23 = vld [vmem:[%s7315_s5 + $0x4a4] sm:$0xf]  ;;  %v4358_v63 = vor.u32 %v4841_v59, %v4357_v58  ;;  %v4062_v43 = vor.u32 %v4762_v8, %v4059_v9  ;;  %v3919_v9 = vld [vmem:[%s7315_s5 + $0x9c] sm:$0xf0] }
  0xff   :  { %2764 = vmatpush.bf16.msra.mxu1 %v4438_v20  ;;  %v4293_v20 = vld [vmem:[%s7315_s5 + $0x380] sm:$0xf]  ;;  %v4727_v8 = vld [vmem:[%s7315_s5 + $0x84] sm:$0xf] }
 0x100   :  { %2792 = vmatpush.bf16.msrb.mxu0 %v4162_v11  ;;  %2705 = vmatmul.bf16.vlgmr.msra.gmra.mxu3 %v6486_v3  ;;  %v1415_v11 = vpop.f32.mrf.mxu0 }
 0x101   :  { %2744 = vmatmul.bf16.vlgmr.msra.gmra.mxu0 %v6486_v3  ;;  %v4830_v11 = vld [vmem:[%s7315_s5 + $0x3bc] sm:$0xf] }
 0x102   :  { %2755 = vmatpush.bf16.msrb.mxu3 %v4102_v33  ;;  %v4410_v33 = vor.u32 %v4851_v26, %v4407_v29  ;;  %v4302_v29 = vor.u32 %v4827_v25, %v4301_v22 }
 0x104   :  { %2793 = vmatpush.bf16.msrb.mxu0 %v4134_v53  ;;  %v4443_v53 = vld [vmem:[%s7315_s5 + $0x4bc] sm:$0xf0]  ;;  %v6552_v38 = vpop.f32.mrf.mxu1  ;;  %2765 = vmatpush.bf16.msra.mxu1 %v4410_v33 }
 0x105   :  { %v4446_v24 = vor.u32 %v4859_v23, %v4443_v53  ;;  %v4823_v23 = vld [vmem:[%s7315_s5 + $0x384] sm:$0xf] }
 0x106   :  { %2756 = vmatpush.bf16.msrb.mxu3 %v4074_v52  ;;  %v4840_v52 = vld [vmem:[%s7315_s5 + $0x408] sm:$0xf0] }
 0x107   :  { %v4350_v56 = vor.u32 %v4840_v52, %v4349_v35 }
 0x108   :  { %2794 = vmatpush.bf16.msrb.mxu0 %v4106_v41  ;;  %v6544_v27 = vpop.f32.mrf.mxu0  ;;  %v4847_v41 = vld [vmem:[%s7315_s5 + $0x440] sm:$0xf0]  ;;  %2766 = vmatpush.bf16.msra.mxu1 %v4382_v47 }
 0x109   :  { %v4378_v44 = vor.u32 %v4847_v41, %v4377_v40  ;;  %v4306_v40 = vor.u32 %v4824_v36, %v4303_v37  ;;  %v4021_v41 = vld [vmem:[%s7315_s5 + $0x158] sm:$0xf]  ;;  %v4715_v36 = vld [vmem:[%s7315_s5 + $0x20] sm:$0xf0] }
 0x10a   :  { %2801 = vmatpush.bf16.msra.mxu3 %v4498_v2  ;;  %v4751_v37 = vld [vmem:[%s7315_s5 + $0x140] sm:$0xf0] }
 0x10b   :  { %2727 = vmatpush.bf16.msrb.mxu2 %v4378_v44  ;;  %v4022_v44 = vor.u32 %v4757_v42, %v4021_v41  ;;  %v232_v42 = vperm.slane %v6127_v55, 3  ;;  %v4744_v55 = vld [vmem:[%s7315_s5 + $0x108] sm:$0xf0] }
 0x10c   :  { %2795 = vmatpush.bf16.msrb.mxu0 %v4078_v1  ;;  %v6578_v50 = vpop.f32.mrf.mxu3  ;;  %v4359_v1 = vld [vmem:[%s7315_s5 + $0x414] sm:$0xf0]  ;;  %2767 = vmatpush.bf16.msra.mxu1 %v4354_v62  ;;  %v4761_v62 = vld [vmem:[%s7315_s5 + $0x194] sm:$0xf] }
 0x10d   :  { %v4362_v6 = vor.u32 %v4838_v0, %v4359_v1 }
 0x10e   :  { %2802 = vmatpush.bf16.msra.mxu3 %v4470_v13  ;;  %v4323_v13 = vld [vmem:[%s7315_s5 + $0x3d4] sm:$0xf0] }
 0x10f   :  { %2728 = vmatpush.bf16.msrb.mxu2 %v4350_v56  ;;  %v4326_v15 = vor.u32 %v4830_v11, %v4323_v13  ;;  %v4736_v56 = vld [vmem:[%s7315_s5 + $0xc8] sm:$0xf0] }
 0x110   :  { %2840 = vmatpush.bf16.msra.mxu0 %v4502_v4  ;;  %v1454_v61 = vpop.f32.mrf.mxu0  ;;  %v1428_v4 = vpop.f32.mrf.mxu1 }
 0x111   :  { %v6604_v2 = vpop.f32.mrf.mxu2  ;;  %2768 = vmatpush.bf16.msra.mxu1 %v4326_v15  ;;  %v3909_v4 = vld [vmem:[%s7315_s5 + $0x78] sm:$0xf] }
 0x112   :  { %2803 = vmatpush.bf16.msra.mxu3 %v4442_v5  ;;  %v4826_v5 = vld [vmem:[%s7315_s5 + $0x398] sm:$0xf0] }
 0x113   :  { %2729 = vmatpush.bf16.msrb.mxu2 %v4322_v10  ;;  %v4294_v53 = vor.u32 %v4826_v5, %v4293_v20  ;;  %v4722_v20 = vld [vmem:[%s7315_s5 + $0x58] sm:$0xf0] }
 0x114   :  { %2841 = vmatpush.bf16.msra.mxu0 %v4474_v14  ;;  %v4329_v14 = vld [vmem:[%s7315_s5 + $0x3c0] sm:$0xf]  ;;  %v1441_v12 = vpop.f32.mrf.mxu3 }
 0x115   :  { %v4330_v18 = vor.u32 %v4834_v16, %v4329_v14  ;;  %v4754_v14 = vld [vmem:[%s7315_s5 + $0x15c] sm:$0xf]  ;;  %v4023_v12 = vld [vmem:[%s7315_s5 + $0x174] sm:$0xf0] }
 0x116   :  { %2804 = vmatpush.bf16.msra.mxu3 %v4414_v34  ;;  %v4050_v34 = vor.u32 %v4764_v32, %v4049_v31  ;;  %v4026_v25 = vor.u32 %v4754_v14, %v4023_v12  ;;  %v3922_v14 = vor.u32 %v4727_v8, %v3919_v9  ;;  %v3883_v12 = vld [vmem:[%s7315_s5 + $0x5c] sm:$0xf0] }
 0x117   :  { %2730 = vmatpush.bf16.msrb.mxu2 %v4294_v53  ;;  %v4755_v53 = vld [vmem:[%s7315_s5 + $0x164] sm:$0xf]  ;;  %v4255_v9 = vld [vmem:[%s7315_s5 + $0x33c] sm:$0xf0] }
 0x118   :  { %2842 = vmatpush.bf16.msra.mxu0 %v4446_v24  ;;  %v4295_v24 = vld [vmem:[%s7315_s5 + $0x39c] sm:$0xf0]  ;;  %v1504_v26 = vpop.f32.mrf.mxu0 }
 0x119   :  { %v4298_v28 = vor.u32 %v4823_v23, %v4295_v24  ;;  %v1467_v33 = vpop.f32.mrf.mxu2  ;;  %v4758_v23 = vld [vmem:[%s7315_s5 + $0x178] sm:$0xf0]  ;;  %v4031_v24 = vld [vmem:[%s7315_s5 + $0x17c] sm:$0xf0] }
 0x11a   :  { %2805 = vmatpush.bf16.msra.mxu3 %v4386_v48  ;;  %v4034_v32 = vor.u32 %v4755_v53, %v4031_v24  ;;  %v4001_v33 = vld [vmem:[%s7315_s5 + $0x128] sm:$0xf] }
 0x11b   :  { %2769 = vmatpush.bf16.msra.mxu1 %v4298_v28  ;;  %2775 = vmatpush.bf16.msra.mxu2 %v4050_v34  ;;  %v3995_v28 = vld [vmem:[%s7315_s5 + $0x13c] sm:$0xf0]  ;;  %v3853_v34 = vld [vmem:[%s7315_s5 + $0x8] sm:$0xf] }
 0x11c   :  { %2843 = vmatpush.bf16.msra.mxu0 %v4418_v39  ;;  %v1427_v39 = vadd.f32 %v6552_v38, %v231_v7  ;;  %v3993_v38 = vld [vmem:[%s7315_s5 + $0x120] sm:$0xf]  ;;  %v4765_v7 = vld [vmem:[%s7315_s5 + $0x1b0] sm:$0xf0]  ;;  %v3854_v41 = vor.u32 %v4715_v36, %v3853_v34  ;;  %v4716_v34 = vld [vmem:[%s7315_s5 + $0x28] sm:$0xf0] }
 0x11d   :  { %v3994_v47 = vor.u32 %v4750_v46, %v3993_v38  ;;  %v4740_v38 = vld [vmem:[%s7315_s5 + $0xec] sm:$0xf]  ;;  %v3967_v46 = vld [vmem:[%s7315_s5 + $0x104] sm:$0xf0]  ;;  %v4713_v36 = vld [vmem:[%s7315_s5 + $0x14] sm:$0xf] }
 0x11e   :  { %2806 = vmatpush.bf16.msra.mxu3 %v4358_v63  ;;  %v1440_v60 = vadd.f32 %v6578_v50, %v1427_v39  ;;  %v4743_v50 = vld [vmem:[%s7315_s5 + $0x100] sm:$0xf0]  ;;  %v4051_v63 = vld [vmem:[%s7315_s5 + $0x1ac] sm:$0xf0]  ;;  %v4748_v39 = vld [vmem:[%s7315_s5 + $0x12c] sm:$0xf] }
 0x11f   :  { %2776 = vmatpush.bf16.msra.mxu2 %v4022_v44  ;;  %v4054_v13 = vor.u32 %v4761_v62, %v4051_v63  ;;  %v4726_v63 = vld [vmem:[%s7315_s5 + $0x7c] sm:$0xf] }
 0x120   :  { %2844 = vmatpush.bf16.msra.mxu0 %v4390_v51  ;;  %v1506_v45 = vpop.f32.mrf.mxu0  ;;  %v1453_v48 = vadd.f32 %v6544_v27, %v1440_v60  ;;  %v3966_v51 = vor.u32 %v4743_v50, %v3965_v30  ;;  %v3937_v27 = vld [vmem:[%s7315_s5 + $0xb0] sm:$0xf]  ;;  %v4002_v60 = vor.u32 %v4751_v37, %v4001_v33  ;;  %v3970_v30 = vor.u32 %v4740_v38, %v3967_v46 }
 0x121   :  { %v3938_v58 = vor.u32 %v4736_v56, %v3937_v27  ;;  %v3945_v27 = vld [vmem:[%s7315_s5 + $0xb8] sm:$0xf]  ;;  %v3863_v37 = vld [vmem:[%s7315_s5 + $0x2c] sm:$0xf0] }
 0x122   :  { %2807 = vmatpush.bf16.msra.mxu3 %v4330_v18  ;;  %v1466_v35 = vadd.f32 %v6604_v2, %v1453_v48  ;;  %v4057_v2 = vld [vmem:[%s7315_s5 + $0x198] sm:$0xf]  ;;  %v4029_v18 = vld [vmem:[%s7315_s5 + $0x160] sm:$0xf]  ;;  %v4741_v48 = vld [vmem:[%s7315_s5 + $0xf4] sm:$0xf] }
 0x123   :  { %2777 = vmatpush.bf16.msra.mxu2 %v3994_v47  ;;  %v4058_v16 = vor.u32 %v4765_v7, %v4057_v2  ;;  %v4030_v31 = vor.u32 %v4758_v23, %v4029_v18  ;;  %v3973_v47 = vld [vmem:[%s7315_s5 + $0xf0] sm:$0xf]  ;;  %v3911_v2 = vld [vmem:[%s7315_s5 + $0x94] sm:$0xf0]  ;;  %v4723_v18 = vld [vmem:[%s7315_s5 + $0x60] sm:$0xf0] }
 0x124   :  { %2845 = vmatpush.bf16.msra.mxu0 %v4362_v6  ;;  %v1478_v49 = vpop.f32.mrf.mxu1  ;;  %v4729_v6 = vld [vmem:[%s7315_s5 + $0x90] sm:$0xf0]  ;;  %v3974_v50 = vor.u32 %v4744_v55, %v3973_v47  ;;  %v4883_v23 = vld [vmem:[#allocation2] ss:$0 sm:$0xff] }
 0x125   :  { %v1479_v52 = vadd.f32 %v1478_v49, %v1466_v35  ;;  %v3910_v10 = vor.u32 %v4729_v6, %v3909_v4  ;;  %v3975_v49 = vld [vmem:[%s7315_s5 + $0x10c] sm:$0xf0]  ;;  %v4733_v35 = vld [vmem:[%s7315_s5 + $0xb4] sm:$0xf]  ;;  %v3917_v4 = vld [vmem:[%s7315_s5 + $0x80] sm:$0xf] }
 0x126   :  { %2808 = vmatpush.bf16.msra.mxu3 %v4302_v29  ;;  %v4730_v6 = vld [vmem:[%s7315_s5 + $0x98] sm:$0xf0] }
 0x127   :  { %2778 = vmatpush.bf16.msra.mxu2 %v3966_v51  ;;  %v3978_v51 = vor.u32 %v4741_v48, %v3975_v49 }
 0x128   :  { %2846 = vmatpush.bf16.msra.mxu0 %v4334_v19  ;;  %v3881_v19 = vld [vmem:[%s7315_s5 + $0x40] sm:$0xf] }
 0x129   :  { %v3882_v22 = vor.u32 %v4722_v20, %v3881_v19  ;;  %v4720_v19 = vld [vmem:[%s7315_s5 + $0x4c] sm:$0xf]  ;;  %v3891_v20 = vld [vmem:[%s7315_s5 + $0x64] sm:$0xf0] }
 0x12b   :  { %2779 = vmatpush.bf16.msra.mxu2 %v3938_v58  ;;  %v4734_v58 = vld [vmem:[%s7315_s5 + $0xbc] sm:$0xf] }
 0x12c   :  { %2847 = vmatpush.bf16.msra.mxu0 %v4306_v40  ;;  %v6683_v54 = vpop.f32.mrf.mxu0  ;;  %v1491_v57 = vpop.f32.mrf.mxu3  ;;  %v4003_v40 = vld [vmem:[%s7315_s5 + $0x144] sm:$0xf0] }
 0x12d   :  { %v1492_v59 = vadd.f32 %v1491_v57, %v1479_v52  ;;  %v1480_v61 = vpop.f32.mrf.mxu1  ;;  %v4006_v45 = vor.u32 %v4748_v39, %v4003_v40  ;;  %v3939_v52 = vld [vmem:[%s7315_s5 + $0xcc] sm:$0xf0]  ;;  %v4737_v57 = vld [vmem:[%s7315_s5 + $0xd0] sm:$0xf0] }
 0x12e   :  { %v3942_v62 = vor.u32 %v4733_v35, %v3939_v52  ;;  %v4821_v35 = vld [vmem:[%s7315_s5 + $0x370] sm:$0xf0]  ;;  %v4818_v52 = vld [vmem:[%s7315_s5 + $0x35c] sm:$0xf] }
 0x12f   :  { %v1505_v0 = vadd.f32 %v1504_v26, %v1492_v59  ;;  %2780 = vmatpush.bf16.msra.mxu2 %v3910_v10  ;;  %v4747_v26 = vld [vmem:[%s7315_s5 + $0x124] sm:$0xf]  ;;  %v3947_v59 = vld [vmem:[%s7315_s5 + $0xd4] sm:$0xf0]  ;;  %v4921_v10 = vmov 0  }
 0x130   :  { %v3998_v44 = vor.u32 %v4747_v26, %v3995_v28  ;;  %4881 = vset.pattern.permute.xlu0 %v4921_v10  ;;  %v3894_v28 = vor.u32 %v4720_v19, %v3891_v20  ;;  %v4261_v10 = vld [vmem:[%s7315_s5 + $0x328] sm:$0xf]  ;;  %v4807_v20 = vld [vmem:[%s7315_s5 + $0x300] sm:$0xf0] }
 0x131   :  { %v6697_v1 = vpop.f32.mrf.mxu2  ;;  %v1601_v11 = vmax.f32 %v1505_v0, 0.0  ;;  %v3946_v0 = vor.u32 %v4737_v57, %v3945_v27  ;;  %v4283_v27 = vld [vmem:[%s7315_s5 + $0x374] sm:$0xf0]  ;;  %v4289_v57 = vld [vmem:[%s7315_s5 + $0x360] sm:$0xf] }
 0x132   :  { %v1518_v56 = vadd.f32 %v6697_v1, %v232_v42  ;;  %v3950_v1 = vor.u32 %v4734_v58, %v3947_v59  ;;  %v4822_v58 = vld [vmem:[%s7315_s5 + $0x378] sm:$0xf0]  ;;  %v4225_v19 = vld [vmem:[%s7315_s5 + $0x2e8] sm:$0xf] }
 0x133   :  { %v6723_v15 = vpack.c.bf16 %v1601_v11, %v1601_v11  ;;  %2781 = vmatpush.bf16.msra.mxu2 %v3882_v22  ;;  %v3914_v11 = vor.u32 %v4726_v63, %v3911_v2  ;;  %v4810_v63 = vld [vmem:[%s7315_s5 + $0x31c] sm:$0xf]  ;;  %v4290_v2 = vor.u32 %v4822_v58, %v4289_v57  ;;  %v4141_v57 = vld [vmem:[%s7315_s5 + $0x240] sm:$0xf] }
 0x134   :  { %v1532_v17 = vpop.f32.mrf.mxu0  ;;  %v1493_v5 = vpop.f32.mrf.mxu3  ;;  %v1531_v7 = vadd.f32 %v6683_v54, %v1518_v56  ;;  %v4719_v54 = vld [vmem:[%s7315_s5 + $0x44] sm:$0xf]  ;;  %v4786_v58 = vld [vmem:[%s7315_s5 + $0x258] sm:$0xf0] }
 0x135   :  { %2718 = vmatmul.bf16.vlgmr.msrb.gmra.mxu1 %v6723_v15  ;;  %2757 = vmatmul.bf16.vlgmr.msrb.gmra.mxu3 %v6723_v15  ;;  %v3886_v22 = vor.u32 %v4719_v54, %v3883_v12 }
 0x136   :  { %2796 = vmatmul.bf16.vlgmr.msrb.gmra.mxu0 %v6723_v15  ;;  %2814 = vmatpush.bf16.msrb.mxu1 %v4054_v13  ;;  %v3918_v13 = vor.u32 %v4730_v6, %v3917_v4  ;;  %v4253_v4 = vld [vmem:[%s7315_s5 + $0x320] sm:$0xf]  ;;  %v4814_v6 = vld [vmem:[%s7315_s5 + $0x338] sm:$0xf0] }
 0x137   :  { %2853 = vmatpush.bf16.msrb.mxu3 %v4058_v16  ;;  %2892 = vmatpush.bf16.msrb.mxu0 %v4062_v43  ;;  %v3889_v16 = vld [vmem:[%s7315_s5 + $0x48] sm:$0xf]  ;;  %v4254_v12 = vor.u32 %v4814_v6, %v4253_v4  ;;  %v4775_v4 = vld [vmem:[%s7315_s5 + $0x204] sm:$0xf]  ;;  %v4107_v6 = vld [vmem:[%s7315_s5 + $0x21c] sm:$0xf0] }
 0x138   :  { %2782 = vmatpush.bf16.msra.mxu2 %v3854_v41  ;;  %v3890_v26 = vor.u32 %v4723_v18, %v3889_v16  ;;  %v4803_v16 = vld [vmem:[%s7315_s5 + $0x2e4] sm:$0xf] }
 0x139   :  { %v1519_v29 = vpop.f32.mrf.mxu2 }
 0x13a   :  { %2815 = vmatpush.bf16.msrb.mxu1 %v4026_v25  ;;  %v4712_v29 = vld [vmem:[%s7315_s5 + $0xc] sm:$0xf] }
 0x13b   :  { %2854 = vmatpush.bf16.msrb.mxu3 %v4030_v31  ;;  %2893 = vmatpush.bf16.msrb.mxu0 %v4034_v32  ;;  %v3855_v31 = vld [vmem:[%s7315_s5 + $0x24] sm:$0xf0]  ;;  %v3861_v32 = vld [vmem:[%s7315_s5 + $0x10] sm:$0xf] }
 0x13c   :  { %v3858_v41 = vor.u32 %v4712_v29, %v3855_v31 }
 0x13e   :  { %2816 = vmatpush.bf16.msrb.mxu1 %v3998_v44  ;;  %v3862_v44 = vor.u32 %v4716_v34, %v3861_v32  ;;  %v4197_v32 = vld [vmem:[%s7315_s5 + $0x2b0] sm:$0xf]  ;;  %v4797_v34 = vld [vmem:[%s7315_s5 + $0x2b4] sm:$0xf] }
 0x13f   :  { %2855 = vmatpush.bf16.msrb.mxu3 %v4002_v60  ;;  %2894 = vmatpush.bf16.msrb.mxu0 %v4006_v45  ;;  %v3866_v60 = vor.u32 %v4713_v36, %v3863_v37  ;;  %v4199_v36 = vld [vmem:[%s7315_s5 + $0x2cc] sm:$0xf0]  ;;  %v4205_v37 = vld [vmem:[%s7315_s5 + $0x2b8] sm:$0xf] }
 0x142   :  { %2817 = vmatpush.bf16.msrb.mxu1 %v3970_v30  ;;  %v4817_v30 = vld [vmem:[%s7315_s5 + $0x354] sm:$0xf] }
 0x143   :  { %2856 = vmatpush.bf16.msrb.mxu3 %v3974_v50  ;;  %2895 = vmatpush.bf16.msrb.mxu0 %v3978_v51  ;;  %v1611_v33 = vpop.xlane.xlu0 %1610  ;;  %v4275_v50 = vld [vmem:[%s7315_s5 + $0x36c] sm:$0xf0]  ;;  %v4281_v51 = vld [vmem:[%s7315_s5 + $0x358] sm:$0xf] }
 0x144   :  { %v1543_v61 = vpop.f32.mrf.mxu1  ;;  %v1616_v40 = vadd.f32 %v4883_v23, %v1611_v33  ;;  %v4278_v59 = vor.u32 %v4817_v30, %v4275_v50  ;;  %v4227_v23 = vld [vmem:[%s7315_s5 + $0x304] sm:$0xf0]  ;;  %v4800_v33 = vld [vmem:[%s7315_s5 + $0x2c8] sm:$0xf0]  ;;  %v4794_v30 = vld [vmem:[%s7315_s5 + $0x298] sm:$0xf0] }
 0x145   :  { %v1544_v43 = vadd.f32 %v1543_v61, %v1531_v7  ;;  %v4811_v7 = vld [vmem:[%s7315_s5 + $0x324] sm:$0xf] }
 0x146   :  { %2818 = vmatpush.bf16.msrb.mxu1 %v3942_v62  ;;  %v1617_v42 = vsub.f32 0.0, %v1616_v40  ;;  %v4282_v62 = vor.u32 %v4821_v35, %v4281_v51  ;;  %v4782_v35 = vld [vmem:[%s7315_s5 + $0x23c] sm:$0xf] }
 0x147   :  { %2857 = vmatpush.bf16.msrb.mxu3 %v3946_v0  ;;  %2896 = vmatpush.bf16.msrb.mxu0 %v3950_v1  ;;  %v4247_v0 = vld [vmem:[%s7315_s5 + $0x334] sm:$0xf0]  ;;  %v4286_v1 = vor.u32 %v4818_v52, %v4283_v27 }
 0x148   :  { %v1618_v38 = vmul.f32 1.442695, %v1617_v42  ;;  %v4250_v54 = vor.u32 %v4810_v63, %v4247_v0  ;;  %v4198_v42 = vor.u32 %v4800_v33, %v4197_v32  ;;  %v4135_v52 = vld [vmem:[%s7315_s5 + $0x254] sm:$0xf0]  ;;  %v4149_v63 = vld [vmem:[%s7315_s5 + $0x248] sm:$0xf] }
 0x149   :  { %v4787_v0 = vld [vmem:[%s7315_s5 + $0x260] sm:$0xf0]  ;;  %v4513_v32 = vld [vmem:[%s7315_s5 + $0x520] sm:$0xf]  ;;  %v4878_v33 = vld [vmem:[%s7315_s5 + $0x538] sm:$0xf0] }
 0x14a   :  { %2819 = vmatpush.bf16.msrb.mxu1 %v3914_v11  ;;  %4884 = vpow2.f32 %v1618_v38  ;;  %v4815_v11 = vld [vmem:[%s7315_s5 + $0x340] sm:$0xf0] }
 0x14b   :  { %2858 = vmatpush.bf16.msrb.mxu3 %v3918_v13  ;;  %2897 = vmatpush.bf16.msrb.mxu0 %v3922_v14  ;;  %v4262_v18 = vor.u32 %v4815_v11, %v4261_v10  ;;  %v4779_v10 = vld [vmem:[%s7315_s5 + $0x220] sm:$0xf0]  ;;  %v4776_v11 = vld [vmem:[%s7315_s5 + $0x20c] sm:$0xf] }
 0x14c   :  { %v1582_v17 = vpop.f32.mrf.mxu0  ;;  %v1556_v5 = vpop.f32.mrf.mxu3 }
 0x14d   :  { %v1557_v53 = vadd.f32 %v1556_v5, %v1544_v43  ;;  %v1545_v24 = vpop.f32.mrf.mxu1  ;;  %v4219_v43 = vld [vmem:[%s7315_s5 + $0x2fc] sm:$0xf0]  ;;  %v4804_v5 = vld [vmem:[%s7315_s5 + $0x2ec] sm:$0xf] }
 0x14e   :  { %2820 = vmatpush.bf16.msrb.mxu1 %v3886_v22  ;;  %v4808_v24 = vld [vmem:[%s7315_s5 + $0x308] sm:$0xf0]  ;;  %v4222_v22 = vor.u32 %v4803_v16, %v4219_v43  ;;  %v4230_v29 = vor.u32 %v4804_v5, %v4227_v23  ;;  %v4079_v43 = vld [vmem:[%s7315_s5 + $0x1e4] sm:$0xf0] }
 0x14f   :  { %v1569_v25 = vpop.f32.mrf.mxu2  ;;  %2859 = vmatpush.bf16.msrb.mxu3 %v3890_v26  ;;  %2898 = vmatpush.bf16.msrb.mxu0 %v3894_v28  ;;  %v4796_v26 = vld [vmem:[%s7315_s5 + $0x2ac] sm:$0xf]  ;;  %v4191_v28 = vld [vmem:[%s7315_s5 + $0x2c4] sm:$0xf0] }
 0x150   :  { %v1570_v39 = vadd.f32 %v1569_v25, %v1557_v53  ;;  %v4885_v8 = vpop.eup %4884  ;;  %v4233_v53 = vld [vmem:[%s7315_s5 + $0x2f0] sm:$0xf]  ;;  %v4226_v25 = vor.u32 %v4807_v20, %v4225_v19  ;;  %v4768_v16 = vld [vmem:[%s7315_s5 + $0x1cc] sm:$0xf]  ;;  %v4769_v20 = vld [vmem:[%s7315_s5 + $0x1d4] sm:$0xf] }
 0x151   :  { %v1620_v13 = vadd.f32 1.0, %v4885_v8  ;;  %v4234_v31 = vor.u32 %v4808_v24, %v4233_v53  ;;  %v4150_v8 = vor.u32 %v4787_v0, %v4149_v63  ;;  %v4772_v19 = vld [vmem:[%s7315_s5 + $0x1e8] sm:$0xf0]  ;;  %v4087_v53 = vld [vmem:[%s7315_s5 + $0x1ec] sm:$0xf0] }
 0x152   :  { %v1583_v47 = vadd.f32 %v1582_v17, %v1570_v39  ;;  %2821 = vmatpush.bf16.msrb.mxu1 %v3858_v41  ;;  %v4258_v17 = vor.u32 %v4811_v7, %v4255_v9  ;;  %v4801_v39 = vld [vmem:[%s7315_s5 + $0x2d0] sm:$0xf0]  ;;  %v4194_v41 = vor.u32 %v4796_v26, %v4191_v28  ;;  %v4113_v9 = vld [vmem:[%s7315_s5 + $0x208] sm:$0xf]  ;;  %v4505_v24 = vld [vmem:[%s7315_s5 + $0x518] sm:$0xf] }
 0x153   :  { %2860 = vmatpush.bf16.msrb.mxu3 %v3862_v44  ;;  %2899 = vmatpush.bf16.msrb.mxu0 %v3866_v60  ;;  %4886 = vrcp.f32 %v1620_v13  ;;  %v4789_v44 = vld [vmem:[%s7315_s5 + $0x274] sm:$0xf]  ;;  %v4163_v60 = vld [vmem:[%s7315_s5 + $0x28c] sm:$0xf0]  ;;  %v4206_v38 = vor.u32 %v4801_v39, %v4205_v37  ;;  %v4115_v13 = vld [vmem:[%s7315_s5 + $0x224] sm:$0xf0]  ;;  %v4090_v37 = vor.u32 %v4769_v20, %v4087_v53 }
 0x154   :  { %v1584_v45 = vpop.f32.mrf.mxu0  ;;  %v1558_v46 = vpop.f32.mrf.mxu3  ;;  %v4166_v50 = vor.u32 %v4789_v44, %v4163_v60  ;;  %v4118_v5 = vor.u32 %v4776_v11, %v4115_v13  ;;  %v4507_v26 = vld [vmem:[%s7315_s5 + $0x534] sm:$0xf0]  ;;  %v4514_v44 = vor.u32 %v4878_v33, %v4513_v32  ;;  %v4867_v60 = vld [vmem:[%s7315_s5 + $0x4e4] sm:$0xf]  ;;  %v4857_v0 = vld [vmem:[%s7315_s5 + $0x490] sm:$0xf0] }
 0x155   :  { %v1595_v55 = vpop.f32.mrf.mxu1  ;;  %v4202_v45 = vor.u32 %v4797_v34, %v4199_v36  ;;  %v4169_v46 = vld [vmem:[%s7315_s5 + $0x278] sm:$0xf]  ;;  %v4401_v11 = vld [vmem:[%s7315_s5 + $0x440] sm:$0xf]  ;;  %v4850_v13 = vld [vmem:[%s7315_s5 + $0x458] sm:$0xf0] }
 0x156   :  { %v1596_v48 = vadd.f32 %v1595_v55, %v1583_v47  ;;  %v4793_v47 = vld [vmem:[%s7315_s5 + $0x290] sm:$0xf0]  ;;  %v4790_v55 = vld [vmem:[%s7315_s5 + $0x27c] sm:$0xf]  ;;  %v4093_v28 = vld [vmem:[%s7315_s5 + $0x1d8] sm:$0xf] }
 0x157   :  { %v1571_v49 = vpop.f32.mrf.mxu2  ;;  %v4170_v51 = vor.u32 %v4793_v47, %v4169_v46  ;;  %v4871_v46 = vld [vmem:[%s7315_s5 + $0x500] sm:$0xf0]  ;;  %v4429_v63 = vld [vmem:[%s7315_s5 + $0x478] sm:$0xf]  ;;  %v4373_v20 = vld [vmem:[%s7315_s5 + $0x408] sm:$0xf] }
 0x158   :  { %v1602_v56 = vmax.f32 %v1596_v48, 0.0  ;;  %v4171_v48 = vld [vmem:[%s7315_s5 + $0x294] sm:$0xf0]  ;;  %v4177_v49 = vld [vmem:[%s7315_s5 + $0x280] sm:$0xf] }
 0x159   :  { %v4887_v40 = vpop.eup %4886  ;;  %v4174_v27 = vor.u32 %v4790_v55, %v4171_v48  ;;  %v4449_v48 = vld [vmem:[%s7315_s5 + $0x4a8] sm:$0xf]  ;;  %v4836_v32 = vld [vmem:[%s7315_s5 + $0x3e8] sm:$0xf0] }
 0x15a   :  { %v6887_v61 = vpack.c.bf16 %v1602_v56, %v1602_v56  ;;  %3000 = vperm.xlu0 %4881, %v4887_v40   ;;  %v4178_v56 = vor.u32 %v4794_v30, %v4177_v49  ;;  %v4477_v40 = vld [vmem:[%s7315_s5 + $0x4e0] sm:$0xf]  ;;  %v4863_v49 = vld [vmem:[%s7315_s5 + $0x4c0] sm:$0xf0] }
 0x15c   :  { %2731 = vmatmul.bf16.vlgmr.msrb.gmra.mxu2 %v6887_v61  ;;  %2770 = vmatmul.bf16.vlgmr.msra.gmra.mxu1 %v6887_v61 }
 0x15d   :  { %2809 = vmatmul.bf16.vlgmr.msra.gmra.mxu3 %v6887_v61  ;;  %2827 = vmatpush.bf16.msrb.mxu2 %v4278_v59  ;;  %v1597_v14 = vpop.f32.mrf.mxu1  ;;  %v4783_v59 = vld [vmem:[%s7315_s5 + $0x244] sm:$0xf] }
 0x15e   :  { %2848 = vmatmul.bf16.vlgmr.msra.gmra.mxu0 %v6887_v61  ;;  %2866 = vmatpush.bf16.msra.mxu1 %v4282_v62  ;;  %v4143_v62 = vld [vmem:[%s7315_s5 + $0x25c] sm:$0xf0]  ;;  %v4121_v14 = vld [vmem:[%s7315_s5 + $0x210] sm:$0xf] }
 0x15f   :  { %2905 = vmatpush.bf16.msra.mxu3 %v4286_v1  ;;  %2944 = vmatpush.bf16.msra.mxu0 %v4290_v2  ;;  %v4138_v1 = vor.u32 %v4782_v35, %v4135_v52  ;;  %v4142_v2 = vor.u32 %v4786_v58, %v4141_v57  ;;  %v4146_v7 = vor.u32 %v4783_v59, %v4143_v62  ;;  %v4457_v35 = vld [vmem:[%s7315_s5 + $0x4b0] sm:$0xf]  ;;  %v4864_v52 = vld [vmem:[%s7315_s5 + $0x4c8] sm:$0xf0]  ;;  %v4853_v62 = vld [vmem:[%s7315_s5 + $0x474] sm:$0xf] }
 0x160   :  { %v4421_v57 = vld [vmem:[%s7315_s5 + $0x470] sm:$0xf]  ;;  %v4856_v58 = vld [vmem:[%s7315_s5 + $0x488] sm:$0xf0]  ;;  %v4458_v59 = vor.u32 %v4864_v52, %v4457_v35 }
 0x161   :  { %2828 = vmatpush.bf16.msrb.mxu2 %v4250_v54  ;;  %v4780_v54 = vld [vmem:[%s7315_s5 + $0x228] sm:$0xf0] }
 0x162   :  { %2867 = vmatpush.bf16.msra.mxu1 %v4254_v12  ;;  %v4110_v12 = vor.u32 %v4775_v4, %v4107_v6  ;;  %v4122_v23 = vor.u32 %v4780_v54, %v4121_v14  ;;  %v4393_v6 = vld [vmem:[%s7315_s5 + $0x438] sm:$0xf]  ;;  %v4752_v35 = vld [vmem:[%s7315_s5 + $0x148] sm:$0xf0] }
 0x163   :  { %2906 = vmatpush.bf16.msra.mxu3 %v4258_v17  ;;  %2945 = vmatpush.bf16.msra.mxu0 %v4262_v18  ;;  %v4114_v17 = vor.u32 %v4779_v10, %v4113_v9  ;;  %v4085_v18 = vld [vmem:[%s7315_s5 + $0x1d0] sm:$0xf]  ;;  %v4846_v9 = vld [vmem:[%s7315_s5 + $0x43c] sm:$0xf]  ;;  %v4395_v10 = vld [vmem:[%s7315_s5 + $0x454] sm:$0xf0] }
 0x164   :  { %v4086_v34 = vor.u32 %v4772_v19, %v4085_v18  ;;  %v4398_v54 = vor.u32 %v4846_v9, %v4395_v10  ;;  %v4839_v18 = vld [vmem:[%s7315_s5 + $0x404] sm:$0xf]  ;;  %v4367_v19 = vld [vmem:[%s7315_s5 + $0x41c] sm:$0xf0] }
 0x165   :  { %2829 = vmatpush.bf16.msrb.mxu2 %v4222_v22  ;;  %v4877_v22 = vld [vmem:[%s7315_s5 + $0x530] sm:$0xf0] }
 0x166   :  { %2868 = vmatpush.bf16.msra.mxu1 %v4226_v25  ;;  %v4874_v25 = vld [vmem:[%s7315_s5 + $0x51c] sm:$0xf]  ;;  %v4506_v36 = vor.u32 %v4877_v22, %v4505_v24  ;;  %v4370_v24 = vor.u32 %v4839_v18, %v4367_v19  ;;  %v4337_v22 = vld [vmem:[%s7315_s5 + $0x3c8] sm:$0xf] }
 0x167   :  { %2907 = vmatpush.bf16.msra.mxu3 %v4230_v29  ;;  %2946 = vmatpush.bf16.msra.mxu0 %v4234_v31  ;;  %v4082_v29 = vor.u32 %v4768_v16, %v4079_v43  ;;  %v4773_v31 = vld [vmem:[%s7315_s5 + $0x1f0] sm:$0xf0]  ;;  %v4510_v39 = vor.u32 %v4874_v25, %v4507_v26  ;;  %v4842_v16 = vld [vmem:[%s7315_s5 + $0x418] sm:$0xf0]  ;;  %v4835_v25 = vld [vmem:[%s7315_s5 + $0x3e0] sm:$0xf0] }
 0x168   :  { %v4338_v33 = vor.u32 %v4835_v25, %v4337_v22 }
 0x169   :  { %2830 = vmatpush.bf16.msrb.mxu2 %v4194_v41  ;;  %v4870_v41 = vld [vmem:[%s7315_s5 + $0x4f8] sm:$0xf0] }
 0x16a   :  { %2869 = vmatpush.bf16.msra.mxu1 %v4198_v42  ;;  %v4094_v42 = vor.u32 %v4773_v31, %v4093_v28  ;;  %v4478_v47 = vor.u32 %v4870_v41, %v4477_v40  ;;  %v4832_v28 = vld [vmem:[%s7315_s5 + $0x3cc] sm:$0xf]  ;;  %v4345_v31 = vld [vmem:[%s7315_s5 + $0x3d0] sm:$0xf] }
 0x16b   :  { %2908 = vmatpush.bf16.msra.mxu3 %v4202_v45  ;;  %2947 = vmatpush.bf16.msra.mxu0 %v4206_v38  ;;  %v4479_v45 = vld [vmem:[%s7315_s5 + $0x4fc] sm:$0xf0]  ;;  %v4485_v38 = vld [vmem:[%s7315_s5 + $0x4e8] sm:$0xf]  ;;  %v4346_v41 = vor.u32 %v4836_v32, %v4345_v31 }
 0x16c   :  { %2783 = vmatmul.bf16.vlgmr.msra.gmra.mxu2 %v6486_v3  ;;  %2822 = vmatmul.bf16.vlgmr.msrb.gmra.mxu1 %v6486_v3  ;;  %v4482_v55 = vor.u32 %v4867_v60, %v4479_v45  ;;  %v4486_v30 = vor.u32 %v4871_v46, %v4485_v38  ;;  %v4766_v60 = vld [vmem:[%s7315_s5 + $0x1b8] sm:$0xf0]  ;;  %v4317_v45 = vld [vmem:[%s7315_s5 + $0x398] sm:$0xf]  ;;  %v4829_v38 = vld [vmem:[%s7315_s5 + $0x3b0] sm:$0xf0] }
 0x16d   :  { %2831 = vmatpush.bf16.msrb.mxu2 %v4166_v50  ;;  %2861 = vmatmul.bf16.vlgmr.msrb.gmra.mxu3 %v6486_v3  ;;  %v4860_v50 = vld [vmem:[%s7315_s5 + $0x4ac] sm:$0xf] }
 0x16e   :  { %2870 = vmatpush.bf16.msra.mxu1 %v4170_v51  ;;  %2900 = vmatmul.bf16.vlgmr.msrb.gmra.mxu0 %v6486_v3  ;;  %v4451_v51 = vld [vmem:[%s7315_s5 + $0x4c4] sm:$0xf0] }
 0x16f   :  { %2909 = vmatpush.bf16.msra.mxu3 %v4174_v27  ;;  %2948 = vmatpush.bf16.msra.mxu0 %v4178_v56  ;;  %v4450_v27 = vor.u32 %v4863_v49, %v4449_v48  ;;  %v4454_v56 = vor.u32 %v4860_v50, %v4451_v51  ;;  %v4318_v48 = vor.u32 %v4829_v38, %v4317_v45  ;;  %v4037_v49 = vld [vmem:[%s7315_s5 + $0x168] sm:$0xf]  ;;  %v4009_v51 = vld [vmem:[%s7315_s5 + $0x130] sm:$0xf] }
 0x170   :  { %v4010_v52 = vor.u32 %v4752_v35, %v4009_v51 }
 0x171   :  { %2832 = vmatpush.bf16.msrb.mxu2 %v4138_v1 }
 0x172   :  { %2871 = vmatpush.bf16.msra.mxu1 %v4142_v2  ;;  %v4422_v2 = vor.u32 %v4856_v58, %v4421_v57  ;;  %v3953_v58 = vld [vmem:[%s7315_s5 + $0xc0] sm:$0xf] }
 0x173   :  { %2910 = vmatpush.bf16.msra.mxu3 %v4146_v7  ;;  %2949 = vmatpush.bf16.msra.mxu0 %v4150_v8  ;;  %v4849_v7 = vld [vmem:[%s7315_s5 + $0x450] sm:$0xf0]  ;;  %v4430_v8 = vor.u32 %v4857_v0, %v4429_v63  ;;  %v3897_v0 = vld [vmem:[%s7315_s5 + $0x50] sm:$0xf] }
 0x174   :  { %v4394_v14 = vor.u32 %v4849_v7, %v4393_v6  ;;  %v3869_v6 = vld [vmem:[%s7315_s5 + $0x18] sm:$0xf]  ;;  %v4717_v7 = vld [vmem:[%s7315_s5 + $0x30] sm:$0xf0] }
 0x175   :  { %2833 = vmatpush.bf16.msrb.mxu2 %v4110_v12  ;;  %v4365_v12 = vld [vmem:[%s7315_s5 + $0x400] sm:$0xf]  ;;  %v3870_v9 = vor.u32 %v4717_v7, %v3869_v6 }
 0x176   :  { %2872 = vmatpush.bf16.msra.mxu1 %v4114_v17  ;;  %v4402_v17 = vor.u32 %v4850_v13, %v4401_v11  ;;  %v4366_v53 = vor.u32 %v4842_v16, %v4365_v12 }
 0x177   :  { %2911 = vmatpush.bf16.msra.mxu3 %v4118_v5  ;;  %2950 = vmatpush.bf16.msra.mxu0 %v4122_v23  ;;  %v4843_v5 = vld [vmem:[%s7315_s5 + $0x420] sm:$0xf0] }
 0x178   :  { %v4374_v26 = vor.u32 %v4843_v5, %v4373_v20 }
 0x179   :  { %2834 = vmatpush.bf16.msrb.mxu2 %v4082_v29  ;;  %v4339_v29 = vld [vmem:[%s7315_s5 + $0x3e4] sm:$0xf0] }
 0x17a   :  { %2873 = vmatpush.bf16.msra.mxu1 %v4086_v34  ;;  %v4342_v34 = vor.u32 %v4832_v28, %v4339_v29 }
 0x17b   :  { %2912 = vmatpush.bf16.msra.mxu3 %v4090_v37  ;;  %2951 = vmatpush.bf16.msra.mxu0 %v4094_v42  ;;  %v4828_v37 = vld [vmem:[%s7315_s5 + $0x3a8] sm:$0xf0]  ;;  %v4311_v42 = vld [vmem:[%s7315_s5 + $0x3ac] sm:$0xf0] }
 0x17c   :  { %2835 = vmatmul.bf16.vlgmr.msrb.gmra.mxu2 %v6723_v15 }
 0x17d   :  { %2879 = vmatpush.bf16.msra.mxu2 %v4506_v36  ;;  %2874 = vmatmul.bf16.vlgmr.msra.gmra.mxu1 %v6723_v15  ;;  %v4309_v36 = vld [vmem:[%s7315_s5 + $0x390] sm:$0xf] }
 0x17e   :  { %2918 = vmatpush.bf16.msrb.mxu1 %v4510_v39  ;;  %2913 = vmatmul.bf16.vlgmr.msra.gmra.mxu3 %v6723_v15  ;;  %v7141_v1 = vpop.f32.mrf.mxu0  ;;  %v4825_v39 = vld [vmem:[%s7315_s5 + $0x394] sm:$0xf]  ;;  %v4310_v46 = vor.u32 %v4828_v37, %v4309_v36 }
 0x17f   :  { %2957 = vmatpush.bf16.msrb.mxu3 %v4514_v44  ;;  %2952 = vmatmul.bf16.vlgmr.msra.gmra.mxu0 %v6723_v15  ;;  %v4423_v15 = vld [vmem:[%s7315_s5 + $0x48c] sm:$0xf0]  ;;  %v4065_v44 = vld [vmem:[%s7315_s5 + $0x1a0] sm:$0xf] }
 0x180   :  { %v4426_v4 = vor.u32 %v4853_v62, %v4423_v15  ;;  %v3925_v62 = vld [vmem:[%s7315_s5 + $0x88] sm:$0xf]  ;;  %v4731_v15 = vld [vmem:[%s7315_s5 + $0xa0] sm:$0xf0] }
 0x181   :  { %2880 = vmatpush.bf16.msra.mxu2 %v4478_v47  ;;  %v4314_v47 = vor.u32 %v4825_v39, %v4311_v42  ;;  %v3926_v63 = vor.u32 %v4731_v15, %v3925_v62 }
 0x182   :  { %2919 = vmatpush.bf16.msrb.mxu1 %v4482_v55  ;;  %v4066_v55 = vor.u32 %v4766_v60, %v4065_v44 }
 0x183   :  { %2958 = vmatpush.bf16.msrb.mxu3 %v4486_v30  ;;  %v7167_v43 = vpop.f32.mrf.mxu3  ;;  %v4759_v30 = vld [vmem:[%s7315_s5 + $0x180] sm:$0xf0] }
 0x184   :  { %v4038_v50 = vor.u32 %v4759_v30, %v4037_v49 }
 0x185   :  { %2881 = vmatpush.bf16.msra.mxu2 %v4450_v27  ;;  %v3981_v27 = vld [vmem:[%s7315_s5 + $0xf8] sm:$0xf] }
 0x186   :  { %2920 = vmatpush.bf16.msrb.mxu1 %v4454_v56  ;;  %v2747_v23 = vpop.f32.mrf.mxu0  ;;  %v4745_v56 = vld [vmem:[%s7315_s5 + $0x110] sm:$0xf0] }
 0x187   :  { %2959 = vmatpush.bf16.msrb.mxu3 %v4458_v59  ;;  %v3982_v57 = vor.u32 %v4745_v56, %v3981_v27 }
 0x189   :  { %2882 = vmatpush.bf16.msra.mxu2 %v4422_v2  ;;  %v4724_v2 = vld [vmem:[%s7315_s5 + $0x68] sm:$0xf0] }
 0x18a   :  { %2921 = vmatpush.bf16.msrb.mxu1 %v4426_v4  ;;  %v3898_v4 = vor.u32 %v4724_v2, %v3897_v0 }
 0x18b   :  { %2960 = vmatpush.bf16.msrb.mxu3 %v4430_v8  ;;  %v2708_v40 = vpop.f32.mrf.mxu3  ;;  %v7271_v8 = vld [vmem:[%s7316_s6] sm:$0x7f] }
 0x18c   :  { %v1819_v10 = vperm.slane %v7271_v8, 0  ;;  %v1821_v38 = vperm.slane %v7271_v8, 2  ;;  %v1823_v49 = vperm.slane %v7271_v8, 4  ;;  %v1822_v27 = vperm.slane %v7271_v8, 3 }
 0x18d   :  { %2883 = vmatpush.bf16.msra.mxu2 %v4394_v14  ;;  %v2970_v14 = vunpack.c.l.bf16 %v5146_v21 }
 0x18e   :  { %2922 = vmatpush.bf16.msrb.mxu1 %v4398_v54  ;;  %v2707_v11 = vadd.f32 %v7167_v43, %v1819_v10  ;;  %v1820_v54 = vperm.slane %v7271_v8, 1 }
 0x18f   :  { %2961 = vmatpush.bf16.msrb.mxu3 %v4402_v17  ;;  %2974 = vst [vmem:[#allocation1] ss:$4 sm:$0xff] %v2970_v14 }
 0x190   :  { %v2746_v17 = vadd.f32 %v7141_v1, %v1820_v54 }
 0x191   :  { %2884 = vmatpush.bf16.msra.mxu2 %v4366_v53 }
 0x192   :  { %2923 = vmatpush.bf16.msrb.mxu1 %v4370_v24 }
 0x193   :  { %2962 = vmatpush.bf16.msrb.mxu3 %v4374_v26 }
 0x195   :  { %2885 = vmatpush.bf16.msra.mxu2 %v4338_v33 }
 0x196   :  { %2924 = vmatpush.bf16.msrb.mxu1 %v4342_v34  ;;  %v2978_v53 = vld.sshfl [vmem:[#allocation1 + $0x8] sm:$0xff pattern:$0x73625140]  ;;  %v2977_v29 = vld.sshfl [vmem:[#allocation1] sm:$0xff pattern:$0x73625140] }
 0x197   :  { %2963 = vmatpush.bf16.msrb.mxu3 %v4346_v41  ;;  %v2980_v2 = vld.sshfl [vmem:[#allocation1 + $0x18] sm:$0xff pattern:$0x73625140] }
 0x199   :  { %2886 = vmatpush.bf16.msra.mxu2 %v4310_v46 }
 0x19a   :  { %2925 = vmatpush.bf16.msrb.mxu1 %v4314_v47  ;;  %v2971_v47 = vunpack.c.h.bf16 %v5146_v21 }
 0x19b   :  { %2964 = vmatpush.bf16.msrb.mxu3 %v4318_v48 }
 0x19c   :  { %2887 = vmatmul.bf16.vlgmr.msra.gmra.mxu2 %v6887_v61  ;;  %2976 = vst [vmem:[#allocation1 + $0x20] ss:$4 sm:$0xff] %v2971_v47 }
 0x19d   :  { %2931 = vmatpush.bf16.msrb.mxu2 %v4066_v55  ;;  %2926 = vmatmul.bf16.vlgmr.msrb.gmra.mxu1 %v6887_v61 }
 0x19e   :  { %2965 = vmatmul.bf16.vlgmr.msrb.gmra.mxu3 %v6887_v61  ;;  %v4738_v61 = vld [vmem:[%s7315_s5 + $0xd8] sm:$0xf0]  ;;  %s4922_s5 = smov [#allocation3]  }
 0x19f   :  { %v3954_v59 = vor.u32 %v4738_v61, %v3953_v58  ;;  %v2979_v61 = vld.sshfl [vmem:[#allocation1 + $0x10] sm:$0xff pattern:$0x73625140]  ;;  %s3044_s6 = sshll.u32 %s4922_s5, 4  ;;  %s3045_s6 = int_to_ptr.vmem [resolvable:$true] %s3044_s6 }
 0x1a1   :  { %2932 = vmatpush.bf16.msrb.mxu2 %v4038_v50 }
 0x1a5   :  { %2933 = vmatpush.bf16.msrb.mxu2 %v4010_v52 }
 0x1a9   :  { %2934 = vmatpush.bf16.msrb.mxu2 %v3982_v57 }
 0x1ad   :  { %2935 = vmatpush.bf16.msrb.mxu2 %v3954_v59 }
 0x1b1   :  { %2936 = vmatpush.bf16.msrb.mxu2 %v3926_v63 }
 0x1b2   :  { %v2719_v13 = vpop.f32.mrf.mxu1 }
 0x1b3   :  { %v2720_v12 = vadd.f32 %v2719_v13, %v2707_v11  ;;  %v2797_v16 = vpop.f32.mrf.mxu0 }
 0x1b5   :  { %2937 = vmatpush.bf16.msrb.mxu2 %v3898_v4 }
 0x1b8   :  { %v2758_v18 = vpop.f32.mrf.mxu3 }
 0x1b9   :  { %2938 = vmatpush.bf16.msrb.mxu2 %v3870_v9  ;;  %v2759_v19 = vadd.f32 %v2758_v18, %v2746_v17 }
 0x1ba   :  { %v2721_v20 = vpop.f32.mrf.mxu1 }
 0x1bb   :  { %v2799_v5 = vpop.f32.mrf.mxu0  ;;  %v1824_v20 = vperm.slane %v7271_v8, 5 }
 0x1bc   :  { %2939 = vmatmul.bf16.vlgmr.msrb.gmra.mxu2 %v6486_v3 }
 0x1c0   :  { %v2760_v23 = vpop.f32.mrf.mxu3 }
 0x1cc   :  { %v7281_v26 = vpop.permute.xlu0 %3000 }
 0x1d9   :  { %v2771_v43 = vpop.f32.mrf.mxu1 }
 0x1da   :  { %v2772_v24 = vadd.f32 %v2771_v43, %v2759_v19 }
 0x1db   :  { %v2849_v22 = vpop.f32.mrf.mxu0 }
 0x1dc   :  { %v2992_v25 = vsub.f32 %v2772_v24, %v2978_v53  ;;  %v2982_v53 = vld.sshfl [vmem:[#allocation1 + $0x28] sm:$0xff pattern:$0x73625140] }
 0x1de   :  { %v3004_v3 = vmul.f32 %v7281_v26, %v2992_v25 }
 0x1df   :  { %v2732_v28 = vpop.f32.mrf.mxu2 }
 0x1e0   :  { %v2733_v31 = vadd.f32 %v2732_v28, %v2720_v12  ;;  %v2810_v32 = vpop.f32.mrf.mxu3  ;;  %v3017_v36 = vrot.slane %v3004_v3, 6  ;;  %v2981_v28 = vld.sshfl [vmem:[#allocation1 + $0x20] sm:$0xff pattern:$0x73625140] }
 0x1e1   :  { %v2773_v33 = vpop.f32.mrf.mxu1 }
 0x1e2   :  { %v2991_v1 = vsub.f32 %v2733_v31, %v2977_v29 }
 0x1e3   :  { %v2851_v34 = vpop.f32.mrf.mxu0 }
 0x1e4   :  { %v3003_v37 = vmul.f32 %v7281_v26, %v2991_v1 }
 0x1e6   :  { %v3022_v39 = vsel %vm1608_vm1, %v3003_v37, %v3017_v36 }
 0x1e7   :  { %v2734_v40 = vpop.f32.mrf.mxu2 }
 0x1e8   :  { %v2812_v41 = vpop.f32.mrf.mxu3 }
 0x1e9   :  { %v2823_v42 = vpop.f32.mrf.mxu1 }
 0x1ea   :  { %v2824_v59 = vadd.f32 %v2823_v42, %v1822_v27 }
 0x1eb   :  { %v2901_v44 = vpop.f32.mrf.mxu0 }
 0x1ec   :  { %v2902_v5 = vadd.f32 %v2901_v44, %v1824_v20  ;;  %v2983_v44 = vld.sshfl [vmem:[#allocation1 + $0x30] sm:$0xff pattern:$0x73625140] }
 0x1ef   :  { %v2784_v60 = vpop.f32.mrf.mxu2 }
 0x1f0   :  { %v2862_v45 = vpop.f32.mrf.mxu3  ;;  %v2785_v48 = vadd.f32 %v2784_v60, %v1821_v38 }
 0x1f1   :  { %v2825_v46 = vpop.f32.mrf.mxu1  ;;  %v2863_v35 = vadd.f32 %v2862_v45, %v1823_v49 }
 0x1f2   :  { %v2798_v51 = vadd.f32 %v2797_v16, %v2785_v48 }
 0x1f3   :  { %v2903_v55 = vpop.f32.mrf.mxu0 }
 0x1f4   :  { %v2811_v58 = vadd.f32 %v2810_v32, %v2798_v51 }
 0x1f6   :  { %v2993_v15 = vsub.f32 %v2811_v58, %v2979_v61 }
 0x1f7   :  { %v2786_v30 = vpop.f32.mrf.mxu2 }
 0x1f8   :  { %v2864_v50 = vpop.f32.mrf.mxu3  ;;  %v3005_v9 = vmul.f32 %v7281_v26, %v2993_v15 }
 0x1fa   :  { %v2875_v52 = vpop.f32.mrf.mxu1  ;;  %v3018_v54 = vrot.slane %v3005_v9, 4 }
 0x1fb   :  { %v2876_v56 = vadd.f32 %v2875_v52, %v2863_v35 }
 0x1fc   :  { %v2953_v57 = vpop.f32.mrf.mxu0 }
 0x1ff   :  { %v2836_v62 = vpop.f32.mrf.mxu2 }
 0x200   :  { %v2837_v63 = vadd.f32 %v2836_v62, %v2824_v59 }
 0x201   :  { %v2914_v0 = vpop.f32.mrf.mxu3 }
 0x202   :  { %v2877_v4 = vpop.f32.mrf.mxu1  ;;  %v2850_v6 = vadd.f32 %v2849_v22, %v2837_v63  ;;  %v2915_v23 = vadd.f32 %v2914_v0, %v2902_v5 }
 0x204   :  { %v2955_v7 = vpop.f32.mrf.mxu0  ;;  %v2994_v10 = vsub.f32 %v2850_v6, %v2980_v2 }
 0x206   :  { %v3006_v11 = vmul.f32 %v7281_v26, %v2994_v10 }
 0x207   :  { %v2838_v13 = vpop.f32.mrf.mxu2 }
 0x208   :  { %v3019_v12 = vrot.slane %v3006_v11, 2 }
 0x209   :  { %v2916_v16 = vpop.f32.mrf.mxu3 }
 0x20a   :  { %v3024_v17 = vsel %vm3023_vm2, %v3018_v54, %v3019_v12 }
 0x20b   :  { %v3026_v18 = vsel %vm3025_vm3, %v3022_v39, %v3024_v17  ;;  %v1825_v39 = vperm.slane %v7271_v8, 6 }
 0x20c   :  { %v3031_v19 = vadd.f32 %v3026_v18, %v2970_v14 }
 0x20e   :  { %3033 = vst [vmem:[#allocation3] sm:$0xff] %v3031_v19 }
 0x21a   :  { %v2927_v43 = vpop.f32.mrf.mxu1 }
 0x21b   :  { %v2928_v24 = vadd.f32 %v2927_v43, %v2915_v23 }
 0x21d   :  { %v2996_v22 = vsub.f32 %v2928_v24, %v2982_v53 }
 0x21f   :  { %v2888_v25 = vpop.f32.mrf.mxu2  ;;  %v3008_v29 = vmul.f32 %v7281_v26, %v2996_v22 }
 0x220   :  { %v2889_v3 = vadd.f32 %v2888_v25, %v2876_v56 }
 0x221   :  { %v2966_v31 = vpop.f32.mrf.mxu3  ;;  %v3020_v1 = vrot.slane %v3008_v29, 6 }
 0x222   :  { %v2995_v32 = vsub.f32 %v2889_v3, %v2981_v28  ;;  %v2929_v33 = vpop.f32.mrf.mxu1 }
 0x224   :  { %v3007_v14 = vmul.f32 %v7281_v26, %v2995_v32 }
 0x226   :  { %v3027_v34 = vsel %vm1608_vm1, %v3007_v14, %v3020_v1 }
 0x227   :  { %v2890_v36 = vpop.f32.mrf.mxu2 }
 0x229   :  { %v2968_v37 = vpop.f32.mrf.mxu3 }
 0x23f   :  { %v2940_v40 = vpop.f32.mrf.mxu2 }
 0x240   :  { %v2941_v41 = vadd.f32 %v2940_v40, %v1825_v39 }
 0x242   :  { %v2954_v42 = vadd.f32 %v2953_v57, %v2941_v41 }
 0x244   :  { %v2967_v60 = vadd.f32 %v2966_v31, %v2954_v42 }
 0x246   :  { %v2997_v45 = vsub.f32 %v2967_v60, %v2983_v44 }
 0x247   :  { %v2942_v38 = vpop.f32.mrf.mxu2 }
 0x248   :  { %v3009_v46 = vmul.f32 %v7281_v26, %v2997_v45 }
 0x24a   :  { %v3021_v55 = vrot.slane %v3009_v46, 4 }
 0x24c   :  { %v3028_v8 = vsel %vm3025_vm3, %v3027_v34, %v3021_v55 }
 0x24d   :  { %v3032_v48 = vadd.f32 %v3028_v8, %v2971_v47 }
 0x24f   :  { %3038 = vst.msk [vmem:[#allocation3 + $0x8] sm:$0x3f] %vm3037_vm7, %v3032_v48 }
 0x250   :  { %3049 = dma.vmem_to_hbm [thread:$0]  %s3045_s6, 224, %s3047_s24, [#allocation4]  }
 0x251   :  { %4919 = dma.done.wait [#allocation4], 224  }
 0x252   :  { %4920 = vsyncadd [#allocation4], 4294967072 }
 0x253   :  { %3054 = vsyncpa [#allocation4], 1 }

</bundles_post_ra>
